<compile_context>
chip_gen: v7x
topology: tpu7x:2x2x1
jax: 0.10.0
libtpu: 0.0.40
codegen_flags: <defaults>
</compile_context>

<pallas_src>
import math

import numpy as np
import jax
import jax.numpy as jnp
from jax.experimental import pallas as pl
from jax.experimental.pallas import tpu as pltpu

LANE = 128     # channel padding target (lane axis)
SUBLANE = 8    # spatial padding target (sublane axis)


def _round_up(n, m):
    return ((n + m - 1) // m) * m


# ----------------------------------------------------------------------------
# Fused multi-branch 3x3 convolution kernel (stride 1, zero pad 1).
#   out = bias + sum_g conv3x3(x_g, w_g)      (== conv over channel-concat)
# ----------------------------------------------------------------------------
def _make_conv3x3_kernel(num_branches):
    def kernel(*refs):
        x_refs = refs[:num_branches]              # each (1, H+2, W+2, Cin) f32
        w_ref = refs[num_branches]                # (num_branches*9, Cin, Cout) bf16
        b_ref = refs[num_branches + 1]            # (1, Cout) f32
        o_ref = refs[num_branches + 2]            # (1, H, W, Cout) f32
        H, W, Cout = o_ref.shape[1], o_ref.shape[2], o_ref.shape[3]

        acc = jnp.zeros((H * W, Cout), jnp.float32)
        for g in range(num_branches):
            xg = x_refs[g][0]                     # (H+2, W+2, Cin), VMEM resident
            for dy in range(3):
                for dx in range(3):
                    patch = xg[dy:dy + H, dx:dx + W, :]          # shifted tap
                    patch = patch.reshape(H * W, patch.shape[-1])
                    w_tap = w_ref[g * 9 + dy * 3 + dx]           # (Cin, Cout)
                    acc = acc + jnp.dot(
                        patch.astype(jnp.bfloat16), w_tap,
                        preferred_element_type=jnp.float32)
        acc = acc + b_ref[...]                    # f32 bias epilogue (once)
        o_ref[...] = acc.reshape(1, H, W, Cout)
    return kernel


def conv3x3_fused(xs, w_flat_bf16, bias_f32):
    """3x3 'same' conv over the channel-concat of the branches in `xs`.

    xs:           list of (B, H, W, Cp) float32 NHWC (channel-padded), same H/W.
    w_flat_bf16:  (len(xs)*9, Cp, Cp) bfloat16, tap index = g*9 + ky*3 + kx,
                  each tap arranged [cin, cout].
    bias_f32:     (1, Cp) float32.
    """
    G = len(xs)
    B, H, W, Cp = xs[0].shape
    xs_halo = [jnp.pad(x, ((0, 0), (1, 1), (1, 1), (0, 0))) for x in xs]

    in_specs = [pl.BlockSpec((1, H + 2, W + 2, Cp), lambda b: (b, 0, 0, 0))
                for _ in range(G)]
    in_specs.append(pl.BlockSpec((G * 9, Cp, Cp), lambda b: (0, 0, 0)))
    in_specs.append(pl.BlockSpec((1, Cp), lambda b: (0, 0)))

    return pl.pallas_call(
        _make_conv3x3_kernel(G),
        out_shape=jax.ShapeDtypeStruct((B, H, W, Cp), jnp.float32),
        grid=(B,),
        in_specs=in_specs,
        out_specs=pl.BlockSpec((1, H, W, Cp), lambda b: (b, 0, 0, 0)),
        compiler_params=pltpu.CompilerParams(
            dimension_semantics=("parallel",)),
    )(*xs_halo, w_flat_bf16, bias_f32)


# ----------------------------------------------------------------------------
# Fused separable resample kernel: out[b,:,:,c] = A_h @ x[b,:,:,c] @ A_w^T.
# Done on the VPU (dense broadcast + sum) so the MXU stays free; both axes are
# handled in one pallas_call (no HBM transpose between them).
# ----------------------------------------------------------------------------
def _resample_kernel(ah_ref, aw_ref, x_ref, o_ref):
    # ah: (Ho, Hi, 1, 1)  aw: (1, Wo, Wi, 1)  x: (1, Hi, Wi, C)  o: (1, Ho, Wo, C)
    x = x_ref[...]                                             # (1, Hi, Wi, C)
    y = jnp.sum(ah_ref[...] * x, axis=1)                       # (Ho, Wi, C)
    z = jnp.sum(aw_ref[...] * y[:, None, :, :], axis=2)        # (Ho, Wo, C)
    o_ref[0] = z


def resample(x, a_h, a_w):
    """x: (B, Hi, Wi, Cp) f32; a_h: (Ho, Hi); a_w: (Wo, Wi)."""
    B, Hi, Wi, Cp = x.shape
    Ho, Wo = a_h.shape[0], a_w.shape[0]
    ah4 = jnp.asarray(a_h, jnp.float32).reshape(Ho, Hi, 1, 1)
    aw4 = jnp.asarray(a_w, jnp.float32).reshape(1, Wo, Wi, 1)
    return pl.pallas_call(
        _resample_kernel,
        out_shape=jax.ShapeDtypeStruct((B, Ho, Wo, Cp), jnp.float32),
        grid=(B,),
        in_specs=[pl.BlockSpec((Ho, Hi, 1, 1), lambda b: (0, 0, 0, 0)),
                  pl.BlockSpec((1, Wo, Wi, 1), lambda b: (0, 0, 0, 0)),
                  pl.BlockSpec((1, Hi, Wi, Cp), lambda b: (b, 0, 0, 0))],
        out_specs=pl.BlockSpec((1, Ho, Wo, Cp), lambda b: (b, 0, 0, 0)),
        compiler_params=pltpu.CompilerParams(
            dimension_semantics=("parallel",)),
    )(ah4, aw4, x)


# ----------------------------------------------------------------------------
# Resampling matrices (numpy, built at trace time; padded rows/cols are zero).
# ----------------------------------------------------------------------------
def avgpool2_matrix(in_true, out_pad, in_pad):
    """AvgPool2d(2) along one axis (floor semantics)."""
    out_true = in_true // 2
    m = np.zeros((out_pad, in_pad), np.float32)
    for i in range(out_true):
        m[i, 2 * i] = 0.5
        m[i, 2 * i + 1] = 0.5
    return m


def bilinear_matrix(out_true, in_true, out_pad, in_pad):
    """F.interpolate(mode='bilinear', align_corners=False) along one axis."""
    m = np.zeros((out_pad, in_pad), np.float32)
    scale = in_true / out_true
    for i in range(out_true):
        src = max((i + 0.5) * scale - 0.5, 0.0)
        i0 = min(int(np.floor(src)), in_true - 1)
        i1 = min(i0 + 1, in_true - 1)
        lam = src - i0
        m[i, i0] += 1.0 - lam
        m[i, i1] += lam
    return m


# ----------------------------------------------------------------------------
# Parameter init (matches nn.Conv2d layout) and packing to kernel layout.
# ----------------------------------------------------------------------------
def init_params(key, ch_in, num_levels=4):
    params = {"pyr_w": [], "pyr_b": []}
    for _ in range(num_levels):
        key, k1, k2 = jax.random.split(key, 3)
        bound = 1.0 / math.sqrt(ch_in * 9)
        params["pyr_w"].append(
            jax.random.uniform(k1, (ch_in, ch_in, 3, 3), jnp.float32, -bound, bound))
        params["pyr_b"].append(
            jax.random.uniform(k2, (ch_in,), jnp.float32, -bound, bound))
    key, k1, k2 = jax.random.split(key, 3)
    bound = 1.0 / math.sqrt(5 * ch_in * 9)
    params["conv_w"] = jax.random.uniform(
        k1, (ch_in, 5 * ch_in, 3, 3), jnp.float32, -bound, bound)
    params["conv_b"] = jax.random.uniform(k2, (ch_in,), jnp.float32, -bound, bound)
    return params


def _pack_conv_weight(w, cp_in, cp_out):
    # w: (Cout, Cin, 3, 3) -> (9, cp_in, cp_out) bf16, tap index = ky*3 + kx.
    cout, cin = w.shape[0], w.shape[1]
    wt = jnp.transpose(w, (2, 3, 1, 0)).reshape(9, cin, cout)
    wt = jnp.pad(wt, ((0, 0), (0, cp_in - cin), (0, cp_out - cout)))
    return wt.astype(jnp.bfloat16)


def _pack_grouped_conv_weight(w, group_size, cp):
    # w: (Cout, G*group_size, 3, 3) -> (G*9, cp, cp) bf16 (split along Cin).
    G = w.shape[1] // group_size
    parts = []
    for g in range(G):
        wg = w[:, g * group_size:(g + 1) * group_size]
        parts.append(_pack_conv_weight(wg, cp, cp))
    return jnp.concatenate(parts, axis=0)


def _pack_bias(b, cp):
    return jnp.pad(b, (0, cp - b.shape[0])).reshape(1, cp).astype(jnp.float32)


# ----------------------------------------------------------------------------
# SPP_v2 forward (Pallas)
# ----------------------------------------------------------------------------
def spp_v2_forward(x_nchw, params, num_levels=4):
    B, C, H, W = x_nchw.shape
    Cp = _round_up(C, LANE)
    Hp, Wp = _round_up(H, SUBLANE), _round_up(W, SUBLANE)

    # NCHW -> NHWC, zero-pad channels to the lane width and spatial to x8.
    x0 = jnp.transpose(x_nchw, (0, 2, 3, 1))
    x0 = jnp.pad(x0, ((0, 0), (0, Hp - H), (0, Wp - W), (0, Cp - C)))

    branches = [x0]
    cur = x0
    h_t, w_t, hp, wp = H, W, Hp, Wp
    for i in range(num_levels):
        nh_t, nw_t = h_t // 2, w_t // 2
        nhp, nwp = _round_up(nh_t, SUBLANE), _round_up(nw_t, SUBLANE)

        # AvgPool2d(2)  (zero-padded rows/cols of the matrices keep pads at 0)
        cur = resample(cur,
                       avgpool2_matrix(h_t, nhp, hp),
                       avgpool2_matrix(w_t, nwp, wp))
        # pyramid_models[i]: 3x3 conv
        wq = _pack_conv_weight(params["pyr_w"][i], Cp, Cp)
        bq = _pack_bias(params["pyr_b"][i], Cp)
        y = conv3x3_fused([cur], wq, bq)
        # bilinear upsample back to (H, W)
        y = resample(y,
                     bilinear_matrix(H, nh_t, Hp, nhp),
                     bilinear_matrix(W, nw_t, Wp, nwp))
        branches.append(y)

        h_t, w_t, hp, wp = nh_t, nw_t, nhp, nwp

    # final conv over the (virtual) channel concat: sum of per-branch convs,
    # accumulated inside one kernel -> the 5*C tensor never hits HBM.
    wq = _pack_grouped_conv_weight(params["conv_w"], C, Cp)
    bq = _pack_bias(params["conv_b"], Cp)
    out = conv3x3_fused(branches, wq, bq)          # (B, Hp, Wp, Cp)

    out = out[:, :H, :W, :C]
    return jnp.transpose(out, (0, 3, 1, 2))        # back to NCHW


# ----------------------------------------------------------------------------
# Pure-JAX f32 reference (for the self-check)
# ----------------------------------------------------------------------------
def _ref_conv3x3(x, w, b):
    y = jax.lax.conv_general_dilated(
        x, w, window_strides=(1, 1), padding=((1, 1), (1, 1)),
        dimension_numbers=("NCHW", "OIHW", "NCHW"),
        precision=jax.lax.Precision.HIGHEST)
    return y + b[None, :, None, None]


def _ref_resample(x, a_h, a_w):
    return jnp.einsum("ph,bchw,qw->bcpq", jnp.asarray(a_h), x, jnp.asarray(a_w),
                      precision=jax.lax.Precision.HIGHEST)


def ref_forward(x, params, num_levels=4):
    B, C, H, W = x.shape
    pyramid = [x]
    cur = x
    for i in range(num_levels):
        _, _, ch, cw = cur.shape
        cur = _ref_resample(cur,
                            avgpool2_matrix(ch, ch // 2, ch),
                            avgpool2_matrix(cw, cw // 2, cw))
        y = _ref_conv3x3(cur, params["pyr_w"][i], params["pyr_b"][i])
        y = _ref_resample(y,
                          bilinear_matrix(H, cur.shape[2], H, cur.shape[2]),
                          bilinear_matrix(W, cur.shape[3], W, cur.shape[3]))
        pyramid.append(y)
    cat = jnp.concatenate(pyramid, axis=1)
    return _ref_conv3x3(cat, params["conv_w"], params["conv_b"])


if __name__ == "__main__":
    key = jax.random.PRNGKey(0)
    kx, kp = jax.random.split(key)

    B, C, H, W = 2, 4, 16, 16
    x = jax.random.normal(kx, (B, C, H, W), jnp.float32)
    params = init_params(kp, C, num_levels=4)

    out = jax.block_until_ready(spp_v2_forward(x, params, num_levels=4))
    assert out.shape == (B, C, H, W), out.shape

    ref = jax.block_until_ready(ref_forward(x, params, num_levels=4))
    # kernel uses bf16 x bf16 -> f32 MXU dots; compare against f32 reference
    np.testing.assert_allclose(np.asarray(out), np.asarray(ref),
                               rtol=2e-2, atol=2e-2)

    print("KERNEL_OK")
</pallas_src>

<mosaic_0001>
module attributes {stable_mosaic.version = 11 : i64} {
  func.func @_resample_kernel(%arg0: i32, %arg1: memref<8x16x1x1xf32, #tpu.memory_space<vmem>>, %arg2: memref<1x8x16x1xf32, #tpu.memory_space<vmem>>, %arg3: memref<1x16x16x128xf32, #tpu.memory_space<vmem>>, %arg4: memref<1x8x8x128xf32, #tpu.memory_space<vmem>>) attributes {dimension_semantics = [#tpu.dimension_semantics<parallel>], iteration_bounds = array<i64: 2>, scalar_prefetch = 0 : i64, scratch_operands = 0 : i64, tpu.core_type = #tpu.core_type<tc>, window_params = [{pipeline_mode = #tpu.pipeline_mode<synchronous>, transform_indices = @transform_0, window_bounds = array<i64: 8, 16, 1, 1>}, {pipeline_mode = #tpu.pipeline_mode<synchronous>, transform_indices = @transform_1, window_bounds = array<i64: 1, 8, 16, 1>}, {transform_indices = @transform_2, window_bounds = array<i64: 1, 16, 16, 128>}, {transform_indices = @transform_3, window_bounds = array<i64: 1, 8, 8, 128>}]} {
    %c0 = arith.constant 0 : index
    %c0_0 = arith.constant 0 : index
    %c0_1 = arith.constant 0 : index
    %c0_2 = arith.constant 0 : index
    %0 = vector.load %arg3[%c0, %c0_0, %c0_1, %c0_2] : memref<1x16x16x128xf32, #tpu.memory_space<vmem>>, vector<1x16x16x128xf32>
    %c0_3 = arith.constant 0 : index
    %c0_4 = arith.constant 0 : index
    %c0_5 = arith.constant 0 : index
    %c0_6 = arith.constant 0 : index
    %1 = vector.load %arg1[%c0_3, %c0_4, %c0_5, %c0_6] : memref<8x16x1x1xf32, #tpu.memory_space<vmem>>, vector<8x16x1x1xf32>
    %2 = vector.broadcast %1 : vector<8x16x1x1xf32> to vector<8x16x16x128xf32>
    %3 = vector.broadcast %0 : vector<1x16x16x128xf32> to vector<8x16x16x128xf32>
    %4 = arith.mulf %2, %3 : vector<8x16x16x128xf32>
    %cst = arith.constant dense<0.000000e+00> : vector<8x16x128xf32>
    %5 = vector.multi_reduction <add>, %4, %cst [1] : vector<8x16x16x128xf32> to vector<8x16x128xf32>
    %c0_7 = arith.constant 0 : index
    %c0_8 = arith.constant 0 : index
    %c0_9 = arith.constant 0 : index
    %c0_10 = arith.constant 0 : index
    %6 = vector.load %arg2[%c0_7, %c0_8, %c0_9, %c0_10] : memref<1x8x16x1xf32, #tpu.memory_space<vmem>>, vector<1x8x16x1xf32>
    %7 = vector.shape_cast %5 : vector<8x16x128xf32> to vector<8x1x16x128xf32>
    %8 = vector.broadcast %6 : vector<1x8x16x1xf32> to vector<8x8x16x128xf32>
    %9 = vector.broadcast %7 : vector<8x1x16x128xf32> to vector<8x8x16x128xf32>
    %10 = arith.mulf %8, %9 : vector<8x8x16x128xf32>
    %cst_11 = arith.constant dense<0.000000e+00> : vector<8x8x128xf32>
    %11 = vector.multi_reduction <add>, %10, %cst_11 [2] : vector<8x8x16x128xf32> to vector<8x8x128xf32>
    %c0_12 = arith.constant 0 : index
    %c0_13 = arith.constant 0 : index
    %c0_14 = arith.constant 0 : index
    %c0_15 = arith.constant 0 : index
    %12 = vector.load %arg4[%c0_12, %c0_13, %c0_14, %c0_15] : memref<1x8x8x128xf32, #tpu.memory_space<vmem>>, vector<1x8x8x128xf32>
    %13 = vector.shape_cast %12 : vector<1x8x8x128xf32> to vector<8x8x128xf32>
    %14 = vector.shape_cast %11 : vector<8x8x128xf32> to vector<1x8x8x128xf32>
    tpu.vector_store %arg4[%c0_12, %c0_13, %c0_14, %c0_15], %14 {strides = array<i32>} : memref<1x8x8x128xf32, #tpu.memory_space<vmem>>, vector<1x8x8x128xf32>,
    return
  }
  func.func @transform_0(%arg0: i32) -> (i32, i32, i32, i32) {
    %c0_i32 = arith.constant 0 : i32
    %c0_i32_0 = arith.constant 0 : i32
    %c0_i32_1 = arith.constant 0 : i32
    %c0_i32_2 = arith.constant 0 : i32
    %c0_i32_3 = arith.constant 0 : i32
    return %c0_i32, %c0_i32_0, %c0_i32_1, %c0_i32_2 : i32, i32, i32, i32
  }
  func.func @transform_1(%arg0: i32) -> (i32, i32, i32, i32) {
    %c0_i32 = arith.constant 0 : i32
    %c0_i32_0 = arith.constant 0 : i32
    %c0_i32_1 = arith.constant 0 : i32
    %c0_i32_2 = arith.constant 0 : i32
    %c0_i32_3 = arith.constant 0 : i32
    return %c0_i32, %c0_i32_0, %c0_i32_1, %c0_i32_2 : i32, i32, i32, i32
  }
  func.func @transform_2(%arg0: i32) -> (i32, i32, i32, i32) {
    %c0_i32 = arith.constant 0 : i32
    %c0_i32_0 = arith.constant 0 : i32
    %c0_i32_1 = arith.constant 0 : i32
    %c0_i32_2 = arith.constant 0 : i32
    return %arg0, %c0_i32, %c0_i32_0, %c0_i32_1 : i32, i32, i32, i32
  }
  func.func @transform_3(%arg0: i32) -> (i32, i32, i32, i32) {
    %c0_i32 = arith.constant 0 : i32
    %c0_i32_0 = arith.constant 0 : i32
    %c0_i32_1 = arith.constant 0 : i32
    %c0_i32_2 = arith.constant 0 : i32
    return %arg0, %c0_i32, %c0_i32_0, %c0_i32_1 : i32, i32, i32, i32
  }
}

</mosaic_0001>

<bundles_post_ra>
// kernel: tpu_custom_call.1
= control target key start
LH: loop header
LB: loop body
LE: loop exit
PB: predicated region body
PF: predicated region fallthrough
CT: control target
= control target key end

     0   :  { %8 = vsyncpa [#allocation3], 0  ;;  %s4821_s0 = inlined_call_operand.vmem [shape: f32[8,16,1,1], index: 0, kind: input, shape index: {}]   ;;  %s4822_s1 = inlined_call_operand.vmem [shape: f32[1,8,16,1], index: 1, kind: input, shape index: {}]   ;;  %s4823_s2 = inlined_call_operand.hbm [shape: f32[2,16,16,128], index: 2, kind: input, shape index: {}]   ;;  %s4824_s3 = inlined_call_operand.hbm [shape: f32[2,8,8,128], index: 3, kind: output, shape index: {}]  }
   0x1   :  { %10 = vsyncpa [#allocation3 + $0x1], 0 }
   0x2   :  { %11 = vsyncpa [#allocation4], 0 }
   0x3   :  { %13 = vsyncpa [#allocation4 + $0x1], 0  ;;  %s3253_s12 = smov 0   ;;  %s3255_s13 = smov 0  }
   0x4   :  { %s3257_s14 = smov 0   ;;  %s3259_s15 = smov 0  }
   0x5 LB: > { %s3274_s16 = sadd.s32 4294967295, %s3224_s15   ;;  %s2899_s17 = sadd.s32 4294967294, %s3224_s15   ;;  %s3224_s15 = sphi %s3259_s15, %s4921_s15   ;;  %s3220_s14 = sphi %s3257_s14, %s4920_s14   ;;  %s3216_s13 = sphi %s3255_s13, %s4919_s13   ;;  %s3212_s12 = sphi %s3253_s12, %s4918_s12  }
   0x6   : > { %s3278_s18 = sadd.s32 1, %s3224_s15   ;;  %s68_s19 = sadd.s32 1, %s3220_s14 }
   0x7   : > { %s65_s20 = ssub.s32 %s3224_s15, %s3278_s18  ;;  %p75_p0 = scmp.ne.s32.totalorder %s3220_s14, %s3216_s13 }
   0x8   : > { %p66_p1 = scmp.eq.s32.totalorder %s65_s20, 0  ;;  %p76_p2 = scmp.eq.s32.totalorder %s3224_s15, 0 }
   0x9   : > { %p81_p3 = scmp.ne.s32.totalorder %s3216_s13, %s3212_s12  ;;  %p82_p4 = scmp.eq.s32.totalorder %s3274_s16, 0 }
   0xa   : > { %s3290_s21 = scalar_select %p66_p1, %s3220_s14, %s68_s19  }
   0xb   : > { %p3292_p5 = por %p76_p2, %p75_p0  ;;  %p3296_p6 = por %p82_p4, %p81_p3 }
   0xc   : > { %p105_p7 = scmp.eq.s32.totalorder %s3274_s16, 1  ;;  %p111_p8 = scmp.eq.s32.totalorder %s2899_s17, 1 }
   0xd   : > { %p3055_p10 = scmp.lt.s32.totalorder %s3224_s15, 2  ;;  %s137_s26 = sand.u32 1, %s3220_s14  }
   0xe   : > { %p3303_p11 = por %p105_p7, %p75_p0  ;;  %p3307_p12 = por %p111_p8, %p81_p3 }
   0xf   : > { %s3041_s27 = sshll.u32 %s3224_s15, 12  ;;  %s2902_s28 = sshll.u32 %s137_s26, 8 }
  0x10   : > { %s4856_s24 = scalar_select %p3303_p11, 1, 0 }
  0x11   : > { %s4857_s25 = scalar_select %p3307_p12, 1, 0 }
  0x12   : > { %s3316_s4 = scalar_lea.hbm %s4823_s2, %s3041_s27  ;;  %s141_s5 = scalar_lea.vmem [#allocation2], %s2902_s28 }
  0x13   : > { %s148_s6 = sshll.u32 %s141_s5, 4  ;;  %p3320_p13 = pnand %p3055_p10, %p3292_p5  ;;  %s3324_s6 = int_to_ptr.vmem [resolvable:$true] %s148_s6 }
  0x14   : > { %s3326_s8 = scalar_lea.sflag [#allocation3], %s137_s26  ;;  %s3128_s9 = scalar_lea.hbm %s3316_s4, 4096 }
  0x15   : > { %p3129_p0 = scmp.ne.s32.totalorder %s3316_s4, %s3128_s9  ;;  %p3130_p1 = pneg %p3320_p13 }
  0x16   : > { %s3133_s17 = scalar_lea.hbm %s4823_s2, 8192  ;;  %p3134_p4 = scmp.lt.u32.totalorder %s3316_s4, %s4823_s2 }
  0x17   : > { %p3131_p2 = pnand %p3130_p1, %p3129_p0  ;;  %p3135_p5 = scmp.lt.u32.totalorder %s3133_s17, %s3128_s9 }
  0x18   : > { %p3137_p8 = scmp.lt.u32.totalorder %s3128_s9, %s3316_s4 }
  0x19   : > { %p3132_p3 = pneg %p3131_p2  ;;  %p3136_p7 = por %p3135_p5, %p3134_p4 }
  0x1b   : > { %p3138_p10 = por %p3137_p8, %p3136_p7 }
  0x1d   : > { %p3139_p9 = pnand %p3138_p10, %p3132_p3 }
  0x1f   : > { %3142 = shalt.err (!%p3139_p9)
}
  0x20   : > { %s3143_s22 = scalar_lea.vmem %s3324_s6, 4096  ;;  %s3226_s26 = smov [#allocation2]  }
  0x21   : > { %p3144_p0 = scmp.ne.s32.totalorder %s3324_s6, %s3143_s22  ;;  %s3148_s27 = sshll.u32 %s3226_s26, 4  ;;  %s3149_s27 = int_to_ptr.vmem [resolvable:$false] %s3148_s27 }
  0x22   : > { %s3150_s28 = scalar_lea.vmem %s3149_s27, 8192  ;;  %p3151_p11 = scmp.lt.s32.totalorder %s3324_s6, %s3149_s27 }
  0x23   : > { %p3146_p2 = pnand %p3144_p0, %p3130_p1  ;;  %p3152_p4 = scmp.lt.s32.totalorder %s3150_s28, %s3143_s22 }
  0x25   : > { %p3147_p12 = pneg %p3146_p2  ;;  %p3153_p5 = por %p3152_p4, %p3151_p11 }
  0x27   : > { %p3154_p7 = pnand %p3153_p5, %p3147_p12 }
  0x29   : > { %3157 = shalt.err (!%p3154_p7)
}
  0x2a   : > { %s3227_s29 = smov 128   ;;  %s3228_s30 = smov 8  }
  0x2b   : > { %3050 = dma.hbm_to_vmem [thread:$0]  (!%p3320_p13), %s3316_s4, 4096, %s3324_s6, %s3326_s8, %s3227_s29, %s3227_s29, %s3228_s30  }
  0x2c   : > { %p2905_p9 = scmp.ge.s32.totalorder %s3224_s15, 1  ;;  %p156_p1 = scmp.lt.s32.totalorder %s3224_s15, 3 }
  0x2e   : > { %p157_p3 = pnand %p2905_p9, %p156_p1 }
  0x30   : > { %160 = sbr.rel (%p157_p3) target bundleno = 620 (0x26c), region = 32 }
  0x37   : > { %s3357_s5 = sand.u32 1, %s3216_s13  }
  0x38   : > { %s2906_s9 = sshll.u32 %s3357_s5, 8  ;;  %s163_s10 = scalar_lea.sflag [#allocation3], %s3357_s5 }
  0x39   : > { %s3361_s11 = scalar_lea.vmem [#allocation2], %s2906_s9 }
  0x3a   : > { %3203 = dma.done.wait (%p3296_p6), %s163_s10, 4096  }
  0x3b   : > { %3205 = vsyncadd (%p3296_p6), %s163_s10, 4294963200  ;;  %v3229_v0 = vmov 0   ;;  %v2910_v1 = vld [vmem:[%s4821_s0 + $0x2] ss:$0 sm:$0xff]  ;;  %v2908_v2 = vld [vmem:[%s4821_s0] ss:$0 sm:$0xff] }
  0x3c   : > { %3095 = vset.pattern.permute.xlu1 %v3229_v0  ;;  %3094 = vset.pattern.permute.xlu0 %v3229_v0  ;;  %v2911_v3 = vld [vmem:[%s4821_s0 + $0x3] ss:$0 sm:$0xff]  ;;  %v2909_v4 = vld [vmem:[%s4821_s0 + $0x1] ss:$0 sm:$0xff]  ;;  %v2913_v5 = vld [vmem:[%s4821_s0 + $0x5] ss:$0 sm:$0xff] }
  0x3d   : > { %998 = vperm.xlu1 %3095, %v2910_v1   ;;  %990 = vperm.xlu0 %3094, %v2908_v2   ;;  %v2912_v6 = vld [vmem:[%s4821_s0 + $0x4] ss:$0 sm:$0xff]  ;;  %v2915_v7 = vld [vmem:[%s4821_s0 + $0x7] ss:$0 sm:$0xff]  ;;  %v2914_v8 = vld [vmem:[%s4821_s0 + $0x6] ss:$0 sm:$0xff] }
  0x3e   : > { %v2917_v9 = vld [vmem:[%s4821_s0 + $0x9] ss:$0 sm:$0xff]  ;;  %v2916_v10 = vld [vmem:[%s4821_s0 + $0x8] ss:$0 sm:$0xff]  ;;  %v2919_v11 = vld [vmem:[%s4821_s0 + $0xb] ss:$0 sm:$0xff] }
  0x3f   : > { %v2918_v12 = vld [vmem:[%s4821_s0 + $0xa] ss:$0 sm:$0xff]  ;;  %v2921_v13 = vld [vmem:[%s4821_s0 + $0xd] ss:$0 sm:$0xff]  ;;  %v2920_v14 = vld [vmem:[%s4821_s0 + $0xc] ss:$0 sm:$0xff] }
  0x40   : > { %v2923_v15 = vld [vmem:[%s4821_s0 + $0xf] ss:$0 sm:$0xff]  ;;  %v2922_v16 = vld [vmem:[%s4821_s0 + $0xe] ss:$0 sm:$0xff]  ;;  %v2925_v17 = vld [vmem:[%s4821_s0 + $0x11] ss:$0 sm:$0xff] }
  0x41   : > { %1002 = vperm.xlu1 %3095, %v2911_v3   ;;  %994 = vperm.xlu0 %3094, %v2909_v4   ;;  %v2924_v18 = vld [vmem:[%s4821_s0 + $0x10] ss:$0 sm:$0xff]  ;;  %v2927_v19 = vld [vmem:[%s4821_s0 + $0x13] ss:$0 sm:$0xff]  ;;  %v2926_v20 = vld [vmem:[%s4821_s0 + $0x12] ss:$0 sm:$0xff] }
  0x42   : > { %v2929_v21 = vld [vmem:[%s4821_s0 + $0x15] ss:$0 sm:$0xff]  ;;  %v2928_v22 = vld [vmem:[%s4821_s0 + $0x14] ss:$0 sm:$0xff]  ;;  %v2931_v23 = vld [vmem:[%s4821_s0 + $0x17] ss:$0 sm:$0xff] }
  0x43   : > { %v2930_v24 = vld [vmem:[%s4821_s0 + $0x16] ss:$0 sm:$0xff]  ;;  %v2933_v25 = vld [vmem:[%s4821_s0 + $0x19] ss:$0 sm:$0xff]  ;;  %v2932_v26 = vld [vmem:[%s4821_s0 + $0x18] ss:$0 sm:$0xff] }
  0x44   : > { %v2935_v27 = vld [vmem:[%s4821_s0 + $0x1b] ss:$0 sm:$0xff]  ;;  %v2934_v28 = vld [vmem:[%s4821_s0 + $0x1a] ss:$0 sm:$0xff]  ;;  %v2937_v29 = vld [vmem:[%s4821_s0 + $0x1d] ss:$0 sm:$0xff] }
  0x45   : > { %1010 = vperm.xlu1 %3095, %v2913_v5   ;;  %1006 = vperm.xlu0 %3094, %v2912_v6   ;;  %v2936_v30 = vld [vmem:[%s4821_s0 + $0x1c] ss:$0 sm:$0xff]  ;;  %v2939_v31 = vld [vmem:[%s4821_s0 + $0x1f] ss:$0 sm:$0xff]  ;;  %v2938_v32 = vld [vmem:[%s4821_s0 + $0x1e] ss:$0 sm:$0xff] }
  0x46   : > { %v2941_v33 = vld [vmem:[%s4821_s0 + $0x21] ss:$0 sm:$0xff]  ;;  %v2940_v34 = vld [vmem:[%s4821_s0 + $0x20] ss:$0 sm:$0xff]  ;;  %v2943_v35 = vld [vmem:[%s4821_s0 + $0x23] ss:$0 sm:$0xff] }
  0x47   : > { %v2942_v36 = vld [vmem:[%s4821_s0 + $0x22] ss:$0 sm:$0xff]  ;;  %v2945_v37 = vld [vmem:[%s4821_s0 + $0x25] ss:$0 sm:$0xff]  ;;  %v2944_v38 = vld [vmem:[%s4821_s0 + $0x24] ss:$0 sm:$0xff] }
  0x48   : > { %v2947_v39 = vld [vmem:[%s4821_s0 + $0x27] ss:$0 sm:$0xff]  ;;  %v2946_v40 = vld [vmem:[%s4821_s0 + $0x26] ss:$0 sm:$0xff]  ;;  %v2949_v41 = vld [vmem:[%s4821_s0 + $0x29] ss:$0 sm:$0xff] }
  0x49   : > { %1018 = vperm.xlu1 %3095, %v2915_v7   ;;  %1014 = vperm.xlu0 %3094, %v2914_v8   ;;  %v2948_v42 = vld [vmem:[%s4821_s0 + $0x28] ss:$0 sm:$0xff]  ;;  %v2951_v43 = vld [vmem:[%s4821_s0 + $0x2b] ss:$0 sm:$0xff]  ;;  %v2950_v44 = vld [vmem:[%s4821_s0 + $0x2a] ss:$0 sm:$0xff] }
  0x4a   : > { %v2953_v45 = vld [vmem:[%s4821_s0 + $0x2d] ss:$0 sm:$0xff]  ;;  %v2952_v46 = vld [vmem:[%s4821_s0 + $0x2c] ss:$0 sm:$0xff]  ;;  %v2955_v47 = vld [vmem:[%s4821_s0 + $0x2f] ss:$0 sm:$0xff] }
  0x4b   : > { %v2954_v48 = vld [vmem:[%s4821_s0 + $0x2e] ss:$0 sm:$0xff]  ;;  %v2957_v49 = vld [vmem:[%s4821_s0 + $0x31] ss:$0 sm:$0xff]  ;;  %v2956_v50 = vld [vmem:[%s4821_s0 + $0x30] ss:$0 sm:$0xff] }
  0x4c   : > { %v2959_v51 = vld [vmem:[%s4821_s0 + $0x33] ss:$0 sm:$0xff]  ;;  %v2958_v52 = vld [vmem:[%s4821_s0 + $0x32] ss:$0 sm:$0xff]  ;;  %v2961_v53 = vld [vmem:[%s4821_s0 + $0x35] ss:$0 sm:$0xff] }
  0x4d   : > { %1026 = vperm.xlu1 %3095, %v2917_v9   ;;  %1022 = vperm.xlu0 %3094, %v2916_v10   ;;  %v2960_v54 = vld [vmem:[%s4821_s0 + $0x34] ss:$0 sm:$0xff]  ;;  %v2963_v55 = vld [vmem:[%s4821_s0 + $0x37] ss:$0 sm:$0xff]  ;;  %v2962_v56 = vld [vmem:[%s4821_s0 + $0x36] ss:$0 sm:$0xff] }
  0x4e   : > { %v2965_v57 = vld [vmem:[%s4821_s0 + $0x39] ss:$0 sm:$0xff]  ;;  %v2964_v58 = vld [vmem:[%s4821_s0 + $0x38] ss:$0 sm:$0xff]  ;;  %v2967_v59 = vld [vmem:[%s4821_s0 + $0x3b] ss:$0 sm:$0xff] }
  0x4f   : > { %v2966_v60 = vld [vmem:[%s4821_s0 + $0x3a] ss:$0 sm:$0xff]  ;;  %v2969_v61 = vld [vmem:[%s4821_s0 + $0x3d] ss:$0 sm:$0xff]  ;;  %v2968_v62 = vld [vmem:[%s4821_s0 + $0x3c] ss:$0 sm:$0xff] }
  0x50   : > { %v2971_v63 = vld [vmem:[%s4821_s0 + $0x3f] ss:$0 sm:$0xff]  ;;  %v2970_v0 = vld [vmem:[%s4821_s0 + $0x3e] ss:$0 sm:$0xff]  ;;  %v2973_v1 = vld [vmem:[%s4821_s0 + $0x41] ss:$0 sm:$0xff] }
  0x51   : > { %1034 = vperm.xlu1 %3095, %v2919_v11   ;;  %1030 = vperm.xlu0 %3094, %v2918_v12   ;;  %v2972_v2 = vld [vmem:[%s4821_s0 + $0x40] ss:$0 sm:$0xff]  ;;  %v2975_v5 = vld [vmem:[%s4821_s0 + $0x43] ss:$0 sm:$0xff]  ;;  %v2974_v6 = vld [vmem:[%s4821_s0 + $0x42] ss:$0 sm:$0xff] }
  0x52   : > { %v2977_v9 = vld [vmem:[%s4821_s0 + $0x45] ss:$0 sm:$0xff]  ;;  %v2976_v10 = vld [vmem:[%s4821_s0 + $0x44] ss:$0 sm:$0xff]  ;;  %vm2733_vm0 = vcmask 1041409   ;;  %vm2735_vm1 = vcmask 1042434  }
  0x53   : > { %vm2737_vm2 = vcmask 1043459   ;;  %vm2739_vm3 = vcmask 1044484   ;;  %vm2741_vm4 = vcmask 1045509   ;;  %vm2743_vm5 = vcmask 1046534   ;;  %s3042_s4 = sshll.u32 %s3274_s16, 10  ;;  %s2813_s19 = scalar_lea.sflag [#allocation4], %s3357_s5 }
  0x54   : > { %vm2745_vm6 = vcmask 1047559   ;;  %s4751_s17 = scalar_lea.hbm %s4824_s3, %s3042_s4  ;;  %p4915_p11 = scmp.ne.s32.totalorder %s4856_s24, 0 }
  0x55   : > { %1042 = vperm.xlu1 %3095, %v2921_v13   ;;  %1038 = vperm.xlu0 %3094, %v2920_v14   ;;  %v2979_v13 = vld [vmem:[%s4821_s0 + $0x47] ss:$0 sm:$0xff]  ;;  %v2978_v14 = vld [vmem:[%s4821_s0 + $0x46] ss:$0 sm:$0xff]  ;;  %s3230_s23 = smov [#allocation5]  }
  0x56   : > { %s3162_s22 = sshll.u32 %s3230_s23, 4  ;;  %s3163_s22 = int_to_ptr.vmem [resolvable:$false] %s3162_s22 }
  0x57   : > { %s3164_s26 = scalar_lea.vmem %s3163_s22, 2048 }
  0x59   : > { %1050 = vperm.xlu1 %3095, %v2923_v15   ;;  %1046 = vperm.xlu0 %3094, %v2922_v16  }
  0x5d   : > { %1058 = vperm.xlu1 %3095, %v2925_v17   ;;  %1054 = vperm.xlu0 %3094, %v2924_v18   ;;  %v2981_v17 = vld [vmem:[%s4821_s0 + $0x49] ss:$0 sm:$0xff]  ;;  %v2980_v18 = vld [vmem:[%s4821_s0 + $0x48] ss:$0 sm:$0xff] }
  0x61   : > { %1066 = vperm.xlu1 %3095, %v2927_v19   ;;  %1062 = vperm.xlu0 %3094, %v2926_v20  }
  0x65   : > { %1074 = vperm.xlu1 %3095, %v2929_v21   ;;  %1070 = vperm.xlu0 %3094, %v2928_v22   ;;  %v2983_v21 = vld [vmem:[%s4821_s0 + $0x4b] ss:$0 sm:$0xff]  ;;  %v2982_v22 = vld [vmem:[%s4821_s0 + $0x4a] ss:$0 sm:$0xff] }
  0x69   : > { %1082 = vperm.xlu1 %3095, %v2931_v23   ;;  %1078 = vperm.xlu0 %3094, %v2930_v24  }
  0x6d   : > { %1090 = vperm.xlu1 %3095, %v2933_v25   ;;  %1086 = vperm.xlu0 %3094, %v2932_v26   ;;  %v2985_v25 = vld [vmem:[%s4821_s0 + $0x4d] ss:$0 sm:$0xff]  ;;  %v2984_v26 = vld [vmem:[%s4821_s0 + $0x4c] ss:$0 sm:$0xff] }
  0x71   : > { %1098 = vperm.xlu1 %3095, %v2935_v27   ;;  %1094 = vperm.xlu0 %3094, %v2934_v28  }
  0x75   : > { %1106 = vperm.xlu1 %3095, %v2937_v29   ;;  %1102 = vperm.xlu0 %3094, %v2936_v30   ;;  %v2987_v29 = vld [vmem:[%s4821_s0 + $0x4f] ss:$0 sm:$0xff]  ;;  %v2986_v30 = vld [vmem:[%s4821_s0 + $0x4e] ss:$0 sm:$0xff] }
  0x79   : > { %1114 = vperm.xlu1 %3095, %v2939_v31   ;;  %1110 = vperm.xlu0 %3094, %v2938_v32  }
  0x7d   : > { %1122 = vperm.xlu1 %3095, %v2941_v33   ;;  %1118 = vperm.xlu0 %3094, %v2940_v34   ;;  %v2989_v33 = vld [vmem:[%s4821_s0 + $0x51] ss:$0 sm:$0xff]  ;;  %v2988_v34 = vld [vmem:[%s4821_s0 + $0x50] ss:$0 sm:$0xff] }
  0x81   : > { %1130 = vperm.xlu1 %3095, %v2943_v35   ;;  %1126 = vperm.xlu0 %3094, %v2942_v36  }
  0x85   : > { %1138 = vperm.xlu1 %3095, %v2945_v37   ;;  %1134 = vperm.xlu0 %3094, %v2944_v38   ;;  %v2991_v37 = vld [vmem:[%s4821_s0 + $0x53] ss:$0 sm:$0xff]  ;;  %v2990_v38 = vld [vmem:[%s4821_s0 + $0x52] ss:$0 sm:$0xff] }
  0x89   : > { %1146 = vperm.xlu1 %3095, %v2947_v39   ;;  %1142 = vperm.xlu0 %3094, %v2946_v40  }
  0x8d   : > { %1154 = vperm.xlu1 %3095, %v2949_v41   ;;  %1150 = vperm.xlu0 %3094, %v2948_v42   ;;  %v2993_v41 = vld [vmem:[%s4821_s0 + $0x55] ss:$0 sm:$0xff]  ;;  %v2992_v42 = vld [vmem:[%s4821_s0 + $0x54] ss:$0 sm:$0xff] }
  0x91   : > { %1162 = vperm.xlu1 %3095, %v2951_v43   ;;  %1158 = vperm.xlu0 %3094, %v2950_v44  }
  0x95   : > { %1170 = vperm.xlu1 %3095, %v2953_v45   ;;  %1166 = vperm.xlu0 %3094, %v2952_v46   ;;  %v2995_v45 = vld [vmem:[%s4821_s0 + $0x57] ss:$0 sm:$0xff]  ;;  %v2994_v46 = vld [vmem:[%s4821_s0 + $0x56] ss:$0 sm:$0xff] }
  0x99   : > { %1178 = vperm.xlu1 %3095, %v2955_v47   ;;  %1174 = vperm.xlu0 %3094, %v2954_v48  }
  0x9d   : > { %1186 = vperm.xlu1 %3095, %v2957_v49   ;;  %1182 = vperm.xlu0 %3094, %v2956_v50   ;;  %v2997_v49 = vld [vmem:[%s4821_s0 + $0x59] ss:$0 sm:$0xff]  ;;  %v2996_v50 = vld [vmem:[%s4821_s0 + $0x58] ss:$0 sm:$0xff] }
  0xa1   : > { %1194 = vperm.xlu1 %3095, %v2959_v51   ;;  %1190 = vperm.xlu0 %3094, %v2958_v52  }
  0xa5   : > { %1202 = vperm.xlu1 %3095, %v2961_v53   ;;  %1198 = vperm.xlu0 %3094, %v2960_v54   ;;  %v2999_v53 = vld [vmem:[%s4821_s0 + $0x5b] ss:$0 sm:$0xff]  ;;  %v2998_v54 = vld [vmem:[%s4821_s0 + $0x5a] ss:$0 sm:$0xff] }
  0xa9   : > { %1210 = vperm.xlu1 %3095, %v2963_v55   ;;  %1206 = vperm.xlu0 %3094, %v2962_v56  }
  0xad   : > { %1218 = vperm.xlu1 %3095, %v2965_v57   ;;  %1214 = vperm.xlu0 %3094, %v2964_v58   ;;  %v3001_v57 = vld [vmem:[%s4821_s0 + $0x5d] ss:$0 sm:$0xff]  ;;  %v3000_v58 = vld [vmem:[%s4821_s0 + $0x5c] ss:$0 sm:$0xff] }
  0xb1   : > { %1226 = vperm.xlu1 %3095, %v2967_v59   ;;  %1222 = vperm.xlu0 %3094, %v2966_v60  }
  0xb5   : > { %1234 = vperm.xlu1 %3095, %v2969_v61   ;;  %1230 = vperm.xlu0 %3094, %v2968_v62   ;;  %v3003_v61 = vld [vmem:[%s4821_s0 + $0x5f] ss:$0 sm:$0xff]  ;;  %v3002_v62 = vld [vmem:[%s4821_s0 + $0x5e] ss:$0 sm:$0xff] }
  0xb9   : > { %1242 = vperm.xlu1 %3095, %v2971_v63   ;;  %1238 = vperm.xlu0 %3094, %v2970_v0  }
  0xbc   : > { %v3565_v3 = vpop.permute.xlu1 %998  ;;  %v3567_v4 = vpop.permute.xlu0 %990 }
  0xbd   : > { %1250 = vperm.xlu1 %3095, %v2973_v1   ;;  %1246 = vperm.xlu0 %3094, %v2972_v2   ;;  %v3005_v1 = vld [vmem:[%s4821_s0 + $0x61] ss:$0 sm:$0xff] }
  0xbe   : > { %v3723_v2 = vld [vmem:[%s3361_s11] sm:$0xff] }
  0xc0   : > { %v3575_v7 = vpop.permute.xlu1 %1002  ;;  %v3577_v8 = vpop.permute.xlu0 %994 }
  0xc1   : > { %1258 = vperm.xlu1 %3095, %v2975_v5   ;;  %1254 = vperm.xlu0 %3094, %v2974_v6   ;;  %v3004_v5 = vld [vmem:[%s4821_s0 + $0x60] ss:$0 sm:$0xff]  ;;  %v3729_v6 = vld [vmem:[%s3361_s11 + $0x8] sm:$0xff] }
  0xc4   : > { %v3585_v11 = vpop.permute.xlu1 %1010  ;;  %v3587_v12 = vpop.permute.xlu0 %1006 }
  0xc5   : > { %1266 = vperm.xlu1 %3095, %v2977_v9   ;;  %1262 = vperm.xlu0 %3094, %v2976_v10   ;;  %v3732_v9 = vld [vmem:[%s3361_s11 + $0x10] sm:$0xff]  ;;  %v3735_v10 = vld [vmem:[%s3361_s11 + $0x18] sm:$0xff] }
  0xc8   : > { %v3595_v15 = vpop.permute.xlu1 %1018  ;;  %v3597_v16 = vpop.permute.xlu0 %1014 }
  0xc9   : > { %4859 = vst [vmem:[#allocation8_spill] sm:$0xff] %v3595_v15  ;;  %1274 = vperm.xlu1 %3095, %v2979_v13   ;;  %1270 = vperm.xlu0 %3094, %v2978_v14  }
  0xcc   : > { %v3605_v19 = vpop.permute.xlu1 %1026  ;;  %v3607_v20 = vpop.permute.xlu0 %1022 }
  0xcd   : > { %4860 = vst [vmem:[#allocation9_spill] sm:$0xff] %v3605_v19  ;;  %4861 = vst [vmem:[#allocation10_spill] sm:$0xff] %v3607_v20  ;;  %1282 = vperm.xlu1 %3095, %v2981_v17   ;;  %1278 = vperm.xlu0 %3094, %v2980_v18   ;;  %v3894_v19 = vld [vmem:[%s3361_s11 + $0xf8] sm:$0xff] }
  0xd0   : > { %v3615_v23 = vpop.permute.xlu1 %1034  ;;  %v3617_v24 = vpop.permute.xlu0 %1030 }
  0xd1   : > { %4862 = vst [vmem:[#allocation11_spill] sm:$0xff] %v3615_v23  ;;  %4863 = vst [vmem:[#allocation12_spill] sm:$0xff] %v3617_v24  ;;  %1290 = vperm.xlu1 %3095, %v2983_v21   ;;  %1286 = vperm.xlu0 %3094, %v2982_v22   ;;  %v3891_v24 = vld [vmem:[%s3361_s11 + $0xf0] sm:$0xff] }
  0xd4   : > { %v3625_v27 = vpop.permute.xlu1 %1042  ;;  %v3627_v28 = vpop.permute.xlu0 %1038 }
  0xd5   : > { %4864 = vst [vmem:[#allocation13_spill] sm:$0xff] %v3625_v27  ;;  %4865 = vst [vmem:[#allocation14_spill] sm:$0xff] %v3627_v28  ;;  %1298 = vperm.xlu1 %3095, %v2985_v25   ;;  %1294 = vperm.xlu0 %3094, %v2984_v26   ;;  %v3007_v25 = vld [vmem:[%s4821_s0 + $0x63] ss:$0 sm:$0xff]  ;;  %v3006_v26 = vld [vmem:[%s4821_s0 + $0x62] ss:$0 sm:$0xff] }
  0xd6   : > { %v3869_v28 = vld [vmem:[%s3361_s11 + $0xd0] sm:$0xff] }
  0xd8   : > { %v3635_v31 = vpop.permute.xlu1 %1050  ;;  %v3637_v32 = vpop.permute.xlu0 %1046 }
  0xd9   : > { %4866 = vst [vmem:[#allocation15_spill] sm:$0xff] %v3635_v31  ;;  %4867 = vst [vmem:[#allocation16_spill] sm:$0xff] %v3637_v32  ;;  %1306 = vperm.xlu1 %3095, %v2987_v29   ;;  %1302 = vperm.xlu0 %3094, %v2986_v30   ;;  %v3748_v29 = vld [vmem:[%s3361_s11 + $0x20] sm:$0xff]  ;;  %v3751_v30 = vld [vmem:[%s3361_s11 + $0x28] sm:$0xff] }
  0xda   : > { %v3017_v32 = vld [vmem:[%s4821_s0 + $0x6d] ss:$0 sm:$0xff]  ;;  %v3847_v31 = vld [vmem:[%s3361_s11 + $0xb0] sm:$0xff] }
  0xdc   : > { %v3645_v35 = vpop.permute.xlu1 %1058  ;;  %v3647_v36 = vpop.permute.xlu0 %1054 }
  0xdd   : > { %1314 = vperm.xlu1 %3095, %v2989_v33   ;;  %1310 = vperm.xlu0 %3094, %v2988_v34  }
  0xe0   : > { %v3655_v39 = vpop.permute.xlu1 %1066  ;;  %v3657_v40 = vpop.permute.xlu0 %1062 }
  0xe1   : > { %4868 = vst [vmem:[#allocation17_spill] sm:$0xff] %v3655_v39  ;;  %1322 = vperm.xlu1 %3095, %v2991_v37   ;;  %1318 = vperm.xlu0 %3094, %v2990_v38  }
  0xe4   : > { %v3665_v43 = vpop.permute.xlu1 %1074  ;;  %v3667_v44 = vpop.permute.xlu0 %1070 }
  0xe5   : > { %4869 = vst [vmem:[#allocation18_spill] sm:$0xff] %v3665_v43  ;;  %4870 = vst [vmem:[#allocation19_spill] sm:$0xff] %v3667_v44  ;;  %1330 = vperm.xlu1 %3095, %v2993_v41   ;;  %1326 = vperm.xlu0 %3094, %v2992_v42   ;;  %v3021_v43 = vld [vmem:[%s4821_s0 + $0x71] ss:$0 sm:$0xff] }
  0xe8   : > { %v3675_v47 = vpop.permute.xlu1 %1082  ;;  %v3677_v48 = vpop.permute.xlu0 %1078 }
  0xe9   : > { %4871 = vst [vmem:[#allocation20_spill] sm:$0xff] %v3675_v47  ;;  %4872 = vst [vmem:[#allocation21_spill] sm:$0xff] %v3677_v48  ;;  %1338 = vperm.xlu1 %3095, %v2995_v45   ;;  %1334 = vperm.xlu0 %3094, %v2994_v46   ;;  %v3009_v45 = vld [vmem:[%s4821_s0 + $0x65] ss:$0 sm:$0xff]  ;;  %v3759_v46 = vld [vmem:[%s3361_s11 + $0x30] sm:$0xff] }
  0xea   : > { %v3019_v47 = vld [vmem:[%s4821_s0 + $0x6f] ss:$0 sm:$0xff] }
  0xec   : > { %v3685_v51 = vpop.permute.xlu1 %1090  ;;  %v3687_v52 = vpop.permute.xlu0 %1086 }
  0xed   : > { %4873 = vst [vmem:[#allocation22_spill] sm:$0xff] %v3685_v51  ;;  %4874 = vst [vmem:[#allocation23_spill] sm:$0xff] %v3687_v52  ;;  %1346 = vperm.xlu1 %3095, %v2997_v49   ;;  %1342 = vperm.xlu0 %3094, %v2996_v50   ;;  %v3762_v49 = vld [vmem:[%s3361_s11 + $0x38] sm:$0xff] }
  0xf0   : > { %v3695_v55 = vpop.permute.xlu1 %1098  ;;  %v3697_v56 = vpop.permute.xlu0 %1094 }
  0xf1   : > { %4875 = vst [vmem:[#allocation24_spill] sm:$0xff] %v3695_v55  ;;  %4876 = vst [vmem:[#allocation25_spill] sm:$0xff] %v3697_v56  ;;  %1354 = vperm.xlu1 %3095, %v2999_v53   ;;  %1350 = vperm.xlu0 %3094, %v2998_v54   ;;  %v3008_v54 = vld [vmem:[%s4821_s0 + $0x64] ss:$0 sm:$0xff]  ;;  %v3825_v55 = vld [vmem:[%s3361_s11 + $0x90] sm:$0xff] }
  0xf4   : > { %v3705_v59 = vpop.permute.xlu1 %1106  ;;  %v3707_v60 = vpop.permute.xlu0 %1102 }
  0xf5   : > { %4877 = vst [vmem:[#allocation26_spill] sm:$0xff] %v3705_v59  ;;  %4878 = vst [vmem:[#allocation27_spill] sm:$0xff] %v3707_v60  ;;  %1362 = vperm.xlu1 %3095, %v3001_v57   ;;  %1358 = vperm.xlu0 %3094, %v3000_v58   ;;  %v3768_v57 = vld [vmem:[%s3361_s11 + $0x40] sm:$0xff]  ;;  %v3771_v58 = vld [vmem:[%s3361_s11 + $0x48] sm:$0xff] }
  0xf6   : > { %v3015_v60 = vld [vmem:[%s4821_s0 + $0x6b] ss:$0 sm:$0xff] }
  0xf8   : > { %v3715_v63 = vpop.permute.xlu1 %1114  ;;  %v3717_v0 = vpop.permute.xlu0 %1110 }
  0xf9   : > { %4879 = vst [vmem:[#allocation28_spill] sm:$0xff] %v3715_v63  ;;  %4880 = vst [vmem:[#allocation29_spill] sm:$0xff] %v3717_v0  ;;  %1370 = vperm.xlu1 %3095, %v3003_v61   ;;  %1366 = vperm.xlu0 %3094, %v3002_v62   ;;  %v3803_v63 = vld [vmem:[%s3361_s11 + $0x70] sm:$0xff] }
  0xfc   : > { %v1123_v13 = vpop.permute.xlu1 %1122  ;;  %v1119_v14 = vpop.permute.xlu0 %1118 }
  0xfd   : > { %v1567_v17 = vmul.f32 %v1123_v13, %v3732_v9  ;;  %v1568_v18 = vmul.f32 %v1123_v13, %v3735_v10  ;;  %v1565_v21 = vmul.f32 %v1119_v14, %v3723_v2  ;;  %v1566_v22 = vmul.f32 %v1119_v14, %v3729_v6  ;;  %1378 = vperm.xlu1 %3095, %v3005_v1  }
  0xfe   : > { %1374 = vperm.xlu0 %3094, %v3004_v5  }
  0xff   : > { %v1817_v37 = vadd.f32 %v1567_v17, %v1565_v21  ;;  %v1832_v38 = vadd.f32 %v1568_v18, %v1566_v22  ;;  %v3011_v21 = vld [vmem:[%s4821_s0 + $0x67] ss:$0 sm:$0xff]  ;;  %v3781_v22 = vld [vmem:[%s3361_s11 + $0x50] sm:$0xff] }
 0x100   : > { %v1131_v33 = vpop.permute.xlu1 %1130  ;;  %v1127_v34 = vpop.permute.xlu0 %1126 }
 0x101   : > { %v1569_v41 = vmul.f32 %v1127_v34, %v3748_v29  ;;  %v1570_v42 = vmul.f32 %v1127_v34, %v3751_v30  ;;  %1386 = vperm.xlu1 %3095, %v3007_v25   ;;  %v1571_v61 = vmul.f32 %v1131_v33, %v3759_v46  ;;  %v1572_v62 = vmul.f32 %v1131_v33, %v3762_v49  ;;  %v3784_v25 = vld [vmem:[%s3361_s11 + $0x58] sm:$0xff]  ;;  %v3790_v33 = vld [vmem:[%s3361_s11 + $0x60] sm:$0xff]  ;;  %v3793_v34 = vld [vmem:[%s3361_s11 + $0x68] sm:$0xff] }
 0x102   : > { %1382 = vperm.xlu0 %3094, %v3006_v26   ;;  %v3010_v26 = vld [vmem:[%s4821_s0 + $0x66] ss:$0 sm:$0xff] }
 0x103   : > { %v1818_v50 = vadd.f32 %v1817_v37, %v1569_v41  ;;  %v1833_v53 = vadd.f32 %v1832_v38, %v1570_v42 }
 0x104   : > { %v1139_v1 = vpop.permute.xlu1 %1138  ;;  %v1135_v5 = vpop.permute.xlu0 %1134 }
 0x105   : > { %v1573_v13 = vmul.f32 %v1135_v5, %v3768_v57  ;;  %v1574_v14 = vmul.f32 %v1135_v5, %v3771_v58  ;;  %1394 = vperm.xlu1 %3095, %v3009_v45   ;;  %v1819_v17 = vadd.f32 %v1818_v50, %v1571_v61  ;;  %v1834_v18 = vadd.f32 %v1833_v53, %v1572_v62  ;;  %v3013_v5 = vld [vmem:[%s4821_s0 + $0x69] ss:$0 sm:$0xff] }
 0x106   : > { %1390 = vperm.xlu0 %3094, %v3008_v54   ;;  %v1575_v37 = vmul.f32 %v1139_v1, %v3781_v22  ;;  %v1576_v38 = vmul.f32 %v1139_v1, %v3784_v25  ;;  %v3806_v1 = vld [vmem:[%s3361_s11 + $0x78] sm:$0xff] }
 0x107   : > { %v1820_v41 = vadd.f32 %v1819_v17, %v1573_v13  ;;  %v1835_v42 = vadd.f32 %v1834_v18, %v1574_v14  ;;  %v3012_v13 = vld [vmem:[%s4821_s0 + $0x68] ss:$0 sm:$0xff]  ;;  %v3812_v14 = vld [vmem:[%s3361_s11 + $0x80] sm:$0xff] }
 0x108   : > { %v1147_v45 = vpop.permute.xlu1 %1146  ;;  %v1143_v50 = vpop.permute.xlu0 %1142  ;;  %v3815_v17 = vld [vmem:[%s3361_s11 + $0x88] sm:$0xff] }
 0x109   : > { %v1577_v53 = vmul.f32 %v1143_v50, %v3790_v33  ;;  %v1578_v54 = vmul.f32 %v1143_v50, %v3793_v34  ;;  %1402 = vperm.xlu1 %3095, %v3011_v21   ;;  %v1821_v61 = vadd.f32 %v1820_v41, %v1575_v37  ;;  %v1836_v62 = vadd.f32 %v1835_v42, %v1576_v38 }
 0x10a   : > { %1398 = vperm.xlu0 %3094, %v3010_v26   ;;  %v1579_v18 = vmul.f32 %v1147_v45, %v3803_v63  ;;  %v1580_v21 = vmul.f32 %v1147_v45, %v3806_v1  ;;  %v3828_v45 = vld [vmem:[%s3361_s11 + $0x98] sm:$0xff] }
 0x10b   : > { %v1822_v26 = vadd.f32 %v1821_v61, %v1577_v53  ;;  %v1837_v37 = vadd.f32 %v1836_v62, %v1578_v54  ;;  %v3014_v53 = vld [vmem:[%s4821_s0 + $0x6a] ss:$0 sm:$0xff]  ;;  %v3834_v54 = vld [vmem:[%s3361_s11 + $0xa0] sm:$0xff] }
 0x10c   : > { %v1155_v38 = vpop.permute.xlu1 %1154  ;;  %v1151_v41 = vpop.permute.xlu0 %1150  ;;  %v3837_v61 = vld [vmem:[%s3361_s11 + $0xa8] sm:$0xff] }
 0x10d   : > { %v1581_v42 = vmul.f32 %v1151_v41, %v3812_v14  ;;  %v1582_v50 = vmul.f32 %v1151_v41, %v3815_v17  ;;  %1410 = vperm.xlu1 %3095, %v3013_v5   ;;  %v1823_v0 = vadd.f32 %v1822_v26, %v1579_v18  ;;  %v1838_v59 = vadd.f32 %v1837_v37, %v1580_v21 }
 0x10e   : > { %1406 = vperm.xlu0 %3094, %v3012_v13   ;;  %v1583_v62 = vmul.f32 %v1155_v38, %v3825_v55  ;;  %v1584_v5 = vmul.f32 %v1155_v38, %v3828_v45  ;;  %v3850_v38 = vld [vmem:[%s3361_s11 + $0xb8] sm:$0xff] }
 0x10f   : > { %v1824_v13 = vadd.f32 %v1823_v0, %v1581_v42  ;;  %v1839_v18 = vadd.f32 %v1838_v59, %v1582_v50  ;;  %v3016_v59 = vld [vmem:[%s4821_s0 + $0x6c] ss:$0 sm:$0xff]  ;;  %v3856_v0 = vld [vmem:[%s3361_s11 + $0xc0] sm:$0xff] }
 0x110   : > { %v1163_v21 = vpop.permute.xlu1 %1162  ;;  %v1159_v26 = vpop.permute.xlu0 %1158 }
 0x111   : > { %v1585_v37 = vmul.f32 %v1159_v26, %v3834_v54  ;;  %v1586_v41 = vmul.f32 %v1159_v26, %v3837_v61  ;;  %1418 = vperm.xlu1 %3095, %v3015_v60   ;;  %v1825_v56 = vadd.f32 %v1824_v13, %v1583_v62  ;;  %v1840_v51 = vadd.f32 %v1839_v18, %v1584_v5  ;;  %v3859_v60 = vld [vmem:[%s3361_s11 + $0xc8] sm:$0xff] }
 0x112   : > { %1414 = vperm.xlu0 %3094, %v3014_v53   ;;  %v1587_v42 = vmul.f32 %v1163_v21, %v3847_v31  ;;  %v1588_v50 = vmul.f32 %v1163_v21, %v3850_v38  ;;  %v3872_v21 = vld [vmem:[%s3361_s11 + $0xd8] sm:$0xff] }
 0x113   : > { %v1826_v53 = vadd.f32 %v1825_v56, %v1585_v37  ;;  %v1841_v62 = vadd.f32 %v1840_v51, %v1586_v41  ;;  %v3018_v51 = vld [vmem:[%s4821_s0 + $0x6e] ss:$0 sm:$0xff]  ;;  %v3878_v56 = vld [vmem:[%s3361_s11 + $0xe0] sm:$0xff] }
 0x114   : > { %v1171_v5 = vpop.permute.xlu1 %1170  ;;  %v1167_v13 = vpop.permute.xlu0 %1166 }
 0x115   : > { %v1589_v18 = vmul.f32 %v1167_v13, %v3856_v0  ;;  %v1590_v26 = vmul.f32 %v1167_v13, %v3859_v60  ;;  %1426 = vperm.xlu1 %3095, %v3017_v32   ;;  %v1827_v27 = vadd.f32 %v1826_v53, %v1587_v42  ;;  %v1842_v52 = vadd.f32 %v1841_v62, %v1588_v50  ;;  %v3881_v32 = vld [vmem:[%s3361_s11 + $0xe8] sm:$0xff] }
 0x116   : > { %1422 = vperm.xlu0 %3094, %v3016_v59   ;;  %v1591_v37 = vmul.f32 %v1171_v5, %v3869_v28  ;;  %v1592_v41 = vmul.f32 %v1171_v5, %v3872_v21 }
 0x117   : > { %v1828_v59 = vadd.f32 %v1827_v27, %v1589_v18  ;;  %v1843_v42 = vadd.f32 %v1842_v52, %v1590_v26  ;;  %v3020_v27 = vld [vmem:[%s4821_s0 + $0x70] ss:$0 sm:$0xff] }
 0x118   : > { %v1179_v50 = vpop.permute.xlu1 %1178  ;;  %v1175_v53 = vpop.permute.xlu0 %1174 }
 0x119   : > { %v1593_v62 = vmul.f32 %v1175_v53, %v3878_v56  ;;  %v1594_v13 = vmul.f32 %v1175_v53, %v3881_v32  ;;  %1434 = vperm.xlu1 %3095, %v3019_v47   ;;  %v1829_v23 = vadd.f32 %v1828_v59, %v1591_v37  ;;  %v1844_v48 = vadd.f32 %v1843_v42, %v1592_v41 }
 0x11a   : > { %1430 = vperm.xlu0 %3094, %v3018_v51   ;;  %v1595_v52 = vmul.f32 %v1179_v50, %v3891_v24  ;;  %v1596_v5 = vmul.f32 %v1179_v50, %v3894_v19 }
 0x11b   : > { %v1830_v47 = vadd.f32 %v1829_v23, %v1593_v62  ;;  %v1845_v18 = vadd.f32 %v1844_v48, %v1594_v13  ;;  %v3023_v23 = vld [vmem:[%s4821_s0 + $0x73] ss:$0 sm:$0xff]  ;;  %v3022_v62 = vld [vmem:[%s4821_s0 + $0x72] ss:$0 sm:$0xff] }
 0x11c   : > { %v1187_v26 = vpop.permute.xlu1 %1186  ;;  %v1183_v51 = vpop.permute.xlu0 %1182 }
 0x11d   : > { %v1599_v37 = vmul.f32 %v1187_v26, %v3732_v9  ;;  %v1600_v41 = vmul.f32 %v1187_v26, %v3735_v10  ;;  %v1597_v59 = vmul.f32 %v1183_v51, %v3723_v2  ;;  %v1598_v42 = vmul.f32 %v1183_v51, %v3729_v6  ;;  %1442 = vperm.xlu1 %3095, %v3021_v43  }
 0x11e   : > { %v3905_v53 = vadd.f32 %v1830_v47, %v1595_v52  ;;  %v3907_v44 = vadd.f32 %v1845_v18, %v1596_v5  ;;  %1438 = vperm.xlu0 %3094, %v3020_v27   ;;  %v3025_v27 = vld [vmem:[%s4821_s0 + $0x75] ss:$0 sm:$0xff]  ;;  %v3024_v47 = vld [vmem:[%s4821_s0 + $0x74] ss:$0 sm:$0xff] }
 0x11f   : > { %v1847_v48 = vadd.f32 %v1599_v37, %v1597_v59  ;;  %v1862_v50 = vadd.f32 %v1600_v41, %v1598_v42 }
 0x120   : > { %4881 = vst [vmem:[#allocation30_spill] sm:$0xff] %v3905_v53  ;;  %4882 = vst [vmem:[#allocation31_spill] sm:$0xff] %v3907_v44  ;;  %v1195_v13 = vpop.permute.xlu1 %1194  ;;  %v1191_v26 = vpop.permute.xlu0 %1190 }
 0x121   : > { %v1601_v51 = vmul.f32 %v1191_v26, %v3748_v29  ;;  %v1602_v43 = vmul.f32 %v1191_v26, %v3751_v30  ;;  %1450 = vperm.xlu1 %3095, %v3023_v23   ;;  %v1603_v18 = vmul.f32 %v1195_v13, %v3759_v46  ;;  %v1604_v37 = vmul.f32 %v1195_v13, %v3762_v49 }
 0x122   : > { %1446 = vperm.xlu0 %3094, %v3022_v62  }
 0x123   : > { %v1848_v52 = vadd.f32 %v1847_v48, %v1601_v51  ;;  %v1863_v5 = vadd.f32 %v1862_v50, %v1602_v43  ;;  %v3027_v48 = vld [vmem:[%s4821_s0 + $0x77] ss:$0 sm:$0xff]  ;;  %v3026_v50 = vld [vmem:[%s4821_s0 + $0x76] ss:$0 sm:$0xff] }
 0x124   : > { %v1203_v41 = vpop.permute.xlu1 %1202  ;;  %v1199_v59 = vpop.permute.xlu0 %1198 }
 0x125   : > { %v1605_v42 = vmul.f32 %v1199_v59, %v3768_v57  ;;  %v1606_v23 = vmul.f32 %v1199_v59, %v3771_v58  ;;  %1458 = vperm.xlu1 %3095, %v3025_v27   ;;  %v1849_v62 = vadd.f32 %v1848_v52, %v1603_v18  ;;  %v1864_v26 = vadd.f32 %v1863_v5, %v1604_v37  ;;  %v3029_v18 = vld [vmem:[%s4821_s0 + $0x79] ss:$0 sm:$0xff]  ;;  %v3028_v37 = vld [vmem:[%s4821_s0 + $0x78] ss:$0 sm:$0xff] }
 0x126   : > { %1454 = vperm.xlu0 %3094, %v3024_v47   ;;  %v1607_v13 = vmul.f32 %v1203_v41, %v3781_v22  ;;  %v1608_v51 = vmul.f32 %v1203_v41, %v3784_v25 }
 0x127   : > { %v1850_v43 = vadd.f32 %v1849_v62, %v1605_v42  ;;  %v1865_v53 = vadd.f32 %v1864_v26, %v1606_v23 }
 0x128   : > { %v1211_v44 = vpop.permute.xlu1 %1210  ;;  %v1207_v59 = vpop.permute.xlu0 %1206 }
 0x129   : > { %v1609_v27 = vmul.f32 %v1207_v59, %v3790_v33  ;;  %v1610_v52 = vmul.f32 %v1207_v59, %v3793_v34  ;;  %1466 = vperm.xlu1 %3095, %v3027_v48   ;;  %v1851_v5 = vadd.f32 %v1850_v43, %v1607_v13  ;;  %v1866_v47 = vadd.f32 %v1865_v53, %v1608_v51  ;;  %v3031_v51 = vld [vmem:[%s4821_s0 + $0x7b] ss:$0 sm:$0xff] }
 0x12a   : > { %1462 = vperm.xlu0 %3094, %v3026_v50   ;;  %v1611_v41 = vmul.f32 %v1211_v44, %v3803_v63  ;;  %v1612_v42 = vmul.f32 %v1211_v44, %v3806_v1  ;;  %v3030_v44 = vld [vmem:[%s4821_s0 + $0x7a] ss:$0 sm:$0xff] }
 0x12b   : > { %v1852_v23 = vadd.f32 %v1851_v5, %v1609_v27  ;;  %v1867_v62 = vadd.f32 %v1866_v47, %v1610_v52 }
 0x12c   : > { %v1219_v26 = vpop.permute.xlu1 %1218  ;;  %v1215_v59 = vpop.permute.xlu0 %1214 }
 0x12d   : > { %v1613_v48 = vmul.f32 %v1215_v59, %v3812_v14  ;;  %v1614_v53 = vmul.f32 %v1215_v59, %v3815_v17  ;;  %1474 = vperm.xlu1 %3095, %v3029_v18   ;;  %v1853_v50 = vadd.f32 %v1852_v23, %v1611_v41  ;;  %v1868_v13 = vadd.f32 %v1867_v62, %v1612_v42  ;;  %v3033_v23 = vld [vmem:[%s4821_s0 + $0x7d] ss:$0 sm:$0xff]  ;;  %v3032_v62 = vld [vmem:[%s4821_s0 + $0x7c] ss:$0 sm:$0xff] }
 0x12e   : > { %1470 = vperm.xlu0 %3094, %v3028_v37   ;;  %v1615_v43 = vmul.f32 %v1219_v26, %v3825_v55  ;;  %v1616_v27 = vmul.f32 %v1219_v26, %v3828_v45 }
 0x12f   : > { %v1854_v52 = vadd.f32 %v1853_v50, %v1613_v48  ;;  %v1869_v5 = vadd.f32 %v1868_v13, %v1614_v53 }
 0x130   : > { %v1227_v47 = vpop.permute.xlu1 %1226  ;;  %v1223_v59 = vpop.permute.xlu0 %1222 }
 0x131   : > { %v1617_v18 = vmul.f32 %v1223_v59, %v3834_v54  ;;  %v1618_v37 = vmul.f32 %v1223_v59, %v3837_v61  ;;  %1482 = vperm.xlu1 %3095, %v3031_v51   ;;  %v1855_v41 = vadd.f32 %v1854_v52, %v1615_v43  ;;  %v1870_v42 = vadd.f32 %v1869_v5, %v1616_v27  ;;  %v3035_v52 = vld [vmem:[%s4821_s0 + $0x7f] ss:$0 sm:$0xff]  ;;  %v3034_v5 = vld [vmem:[%s4821_s0 + $0x7e] ss:$0 sm:$0xff] }
 0x132   : > { %1478 = vperm.xlu0 %3094, %v3030_v44   ;;  %v1619_v26 = vmul.f32 %v1227_v47, %v3847_v31  ;;  %v1620_v48 = vmul.f32 %v1227_v47, %v3850_v38 }
 0x133   : > { %v1856_v53 = vadd.f32 %v1855_v41, %v1617_v18  ;;  %v1871_v50 = vadd.f32 %v1870_v42, %v1618_v37 }
 0x134   : > { %v1235_v13 = vpop.permute.xlu1 %1234  ;;  %v1231_v59 = vpop.permute.xlu0 %1230 }
 0x135   : > { %v1621_v51 = vmul.f32 %v1231_v59, %v3856_v0  ;;  %v1622_v44 = vmul.f32 %v1231_v59, %v3859_v60  ;;  %1490 = vperm.xlu1 %3095, %v3033_v23   ;;  %v1857_v43 = vadd.f32 %v1856_v53, %v1619_v26  ;;  %v1872_v27 = vadd.f32 %v1871_v50, %v1620_v48  ;;  %v1998_v53 = vld [vmem:[%s4822_s1 + $0x8] sm:$0xff]  ;;  %v1997_v50 = vld [vmem:[%s4822_s1] sm:$0xff] }
 0x136   : > { %1486 = vperm.xlu0 %3094, %v3032_v62   ;;  %v1623_v47 = vmul.f32 %v1235_v13, %v3869_v28  ;;  %v1624_v18 = vmul.f32 %v1235_v13, %v3872_v21 }
 0x137   : > { %v1858_v37 = vadd.f32 %v1857_v43, %v1621_v51  ;;  %v1873_v41 = vadd.f32 %v1872_v27, %v1622_v44 }
 0x138   : > { %v1243_v42 = vpop.permute.xlu1 %1242  ;;  %v1239_v59 = vpop.permute.xlu0 %1238 }
 0x139   : > { %v1625_v23 = vmul.f32 %v1239_v59, %v3878_v56  ;;  %v1626_v62 = vmul.f32 %v1239_v59, %v3881_v32  ;;  %1498 = vperm.xlu1 %3095, %v3035_v52   ;;  %v1859_v26 = vadd.f32 %v1858_v37, %v1623_v47  ;;  %v1874_v48 = vadd.f32 %v1873_v41, %v1624_v18 }
 0x13a   : > { %1494 = vperm.xlu0 %3094, %v3034_v5   ;;  %v1627_v13 = vmul.f32 %v1243_v42, %v3891_v24  ;;  %v1628_v51 = vmul.f32 %v1243_v42, %v3894_v19  ;;  %v2000_v42 = vld [vmem:[%s4822_s1 + $0x18] sm:$0xff] }
 0x13b   : > { %v1860_v44 = vadd.f32 %v1859_v26, %v1625_v23  ;;  %v1875_v43 = vadd.f32 %v1874_v48, %v1626_v62  ;;  %v1999_v23 = vld [vmem:[%s4822_s1 + $0x10] sm:$0xff] }
 0x13c   : > { %v1251_v27 = vpop.permute.xlu1 %1250  ;;  %v1247_v5 = vpop.permute.xlu0 %1246 }
 0x13d   : > { %v1631_v52 = vmul.f32 %v1251_v27, %v3732_v9  ;;  %v1632_v47 = vmul.f32 %v1251_v27, %v3735_v10  ;;  %2020 = vperm.xlu1 %3095, %v1998_v53   ;;  %v3987_v18 = vadd.f32 %v1860_v44, %v1627_v13  ;;  %v3989_v37 = vadd.f32 %v1875_v43, %v1628_v51  ;;  %v2001_v44 = vld [vmem:[%s4822_s1 + $0x20] sm:$0xff] }
 0x13e   : > { %v1629_v41 = vmul.f32 %v1247_v5, %v3723_v2  ;;  %v1630_v59 = vmul.f32 %v1247_v5, %v3729_v6  ;;  %2015 = vperm.xlu0 %3094, %v1997_v50   ;;  %v2002_v50 = vld [vmem:[%s4822_s1 + $0x28] sm:$0xff] }
 0x13f   : > { %4883 = vst [vmem:[#allocation32_spill] sm:$0xff] %v3987_v18  ;;  %4884 = vst [vmem:[#allocation33_spill] sm:$0xff] %v3989_v37  ;;  %v2004_v18 = vld [vmem:[%s4822_s1 + $0x38] sm:$0xff] }
 0x140   : > { %v1877_v62 = vadd.f32 %v1631_v52, %v1629_v41  ;;  %v1892_v26 = vadd.f32 %v1632_v47, %v1630_v59  ;;  %v1259_v48 = vpop.permute.xlu1 %1258  ;;  %v1255_v53 = vpop.permute.xlu0 %1254 }
 0x141   : > { %2030 = vperm.xlu1 %3095, %v2000_v42   ;;  %v1633_v13 = vmul.f32 %v1255_v53, %v3748_v29  ;;  %v1634_v51 = vmul.f32 %v1255_v53, %v3751_v30  ;;  %v1635_v43 = vmul.f32 %v1259_v48, %v3759_v46  ;;  %v1636_v27 = vmul.f32 %v1259_v48, %v3762_v49  ;;  %v2003_v48 = vld [vmem:[%s4822_s1 + $0x30] sm:$0xff] }
 0x142   : > { %2025 = vperm.xlu0 %3094, %v1999_v23  }
 0x143   : > { %v1878_v52 = vadd.f32 %v1877_v62, %v1633_v13  ;;  %v1893_v47 = vadd.f32 %v1892_v26, %v1634_v51 }
 0x144   : > { %v1267_v5 = vpop.permute.xlu1 %1266  ;;  %v1263_v41 = vpop.permute.xlu0 %1262 }
 0x145   : > { %2040 = vperm.xlu1 %3095, %v2002_v50   ;;  %v1637_v59 = vmul.f32 %v1263_v41, %v3768_v57  ;;  %v1638_v42 = vmul.f32 %v1263_v41, %v3771_v58  ;;  %v1879_v23 = vadd.f32 %v1878_v52, %v1635_v43  ;;  %v1894_v53 = vadd.f32 %v1893_v47, %v1636_v27  ;;  %v2006_v47 = vld [vmem:[%s4822_s1 + $0x48] sm:$0xff] }
 0x146   : > { %2035 = vperm.xlu0 %3094, %v2001_v44   ;;  %v1639_v62 = vmul.f32 %v1267_v5, %v3781_v22  ;;  %v1640_v26 = vmul.f32 %v1267_v5, %v3784_v25  ;;  %v2005_v5 = vld [vmem:[%s4822_s1 + $0x40] sm:$0xff] }
 0x147   : > { %v1880_v13 = vadd.f32 %v1879_v23, %v1637_v59  ;;  %v1895_v51 = vadd.f32 %v1894_v53, %v1638_v42 }
 0x148   : > { %v1275_v50 = vpop.permute.xlu1 %1274  ;;  %v1271_v37 = vpop.permute.xlu0 %1270 }
 0x149   : > { %2050 = vperm.xlu1 %3095, %v2004_v18   ;;  %v1641_v43 = vmul.f32 %v1271_v37, %v3790_v33  ;;  %v1642_v44 = vmul.f32 %v1271_v37, %v3793_v34  ;;  %v1881_v27 = vadd.f32 %v1880_v13, %v1639_v62  ;;  %v1896_v52 = vadd.f32 %v1895_v51, %v1640_v26  ;;  %v2008_v13 = vld [vmem:[%s4822_s1 + $0x58] sm:$0xff]  ;;  %v2007_v51 = vld [vmem:[%s4822_s1 + $0x50] sm:$0xff] }
 0x14a   : > { %2045 = vperm.xlu0 %3094, %v2003_v48   ;;  %v1643_v41 = vmul.f32 %v1275_v50, %v3803_v63  ;;  %v1644_v59 = vmul.f32 %v1275_v50, %v3806_v1 }
 0x14b   : > { %v1882_v18 = vadd.f32 %v1881_v27, %v1641_v43  ;;  %v1897_v42 = vadd.f32 %v1896_v52, %v1642_v44 }
 0x14c   : > { %v1283_v23 = vpop.permute.xlu1 %1282  ;;  %v1279_v53 = vpop.permute.xlu0 %1278 }
 0x14d   : > { %2060 = vperm.xlu1 %3095, %v2006_v47   ;;  %v1645_v37 = vmul.f32 %v1279_v53, %v3812_v14  ;;  %v1646_v48 = vmul.f32 %v1279_v53, %v3815_v17  ;;  %v1883_v62 = vadd.f32 %v1882_v18, %v1643_v41  ;;  %v1898_v26 = vadd.f32 %v1897_v42, %v1644_v59  ;;  %v2010_v42 = vld [vmem:[%s4822_s1 + $0x68] sm:$0xff] }
 0x14e   : > { %2055 = vperm.xlu0 %3094, %v2005_v5   ;;  %v1647_v50 = vmul.f32 %v1283_v23, %v3825_v55  ;;  %v1648_v43 = vmul.f32 %v1283_v23, %v3828_v45  ;;  %v2009_v23 = vld [vmem:[%s4822_s1 + $0x60] sm:$0xff] }
 0x14f   : > { %v1884_v44 = vadd.f32 %v1883_v62, %v1645_v37  ;;  %v1899_v27 = vadd.f32 %v1898_v26, %v1646_v48 }
 0x150   : > { %v1291_v52 = vpop.permute.xlu1 %1290  ;;  %v1287_v47 = vpop.permute.xlu0 %1286 }
 0x151   : > { %2070 = vperm.xlu1 %3095, %v2008_v13   ;;  %v1649_v41 = vmul.f32 %v1287_v47, %v3834_v54  ;;  %v1650_v5 = vmul.f32 %v1287_v47, %v3837_v61  ;;  %v1885_v59 = vadd.f32 %v1884_v44, %v1647_v50  ;;  %v1900_v18 = vadd.f32 %v1899_v27, %v1648_v43  ;;  %v2012_v27 = vld [vmem:[%s4822_s1 + $0x78] sm:$0xff] }
 0x152   : > { %2065 = vperm.xlu0 %3094, %v2007_v51   ;;  %v1651_v53 = vmul.f32 %v1291_v52, %v3847_v31  ;;  %v1652_v37 = vmul.f32 %v1291_v52, %v3850_v38  ;;  %v2011_v52 = vld [vmem:[%s4822_s1 + $0x70] sm:$0xff] }
 0x153   : > { %v1886_v48 = vadd.f32 %v1885_v59, %v1649_v41  ;;  %v1901_v62 = vadd.f32 %v1900_v18, %v1650_v5 }
 0x154   : > { %v1299_v26 = vpop.permute.xlu1 %1298  ;;  %v1295_v13 = vpop.permute.xlu0 %1294 }
 0x155   : > { %2080 = vperm.xlu1 %3095, %v2010_v42   ;;  %v1653_v50 = vmul.f32 %v1295_v13, %v3856_v0  ;;  %v1654_v51 = vmul.f32 %v1295_v13, %v3859_v60  ;;  %v1887_v43 = vadd.f32 %v1886_v48, %v1651_v53  ;;  %v1902_v44 = vadd.f32 %v1901_v62, %v1652_v37 }
 0x156   : > { %2075 = vperm.xlu0 %3094, %v2009_v23   ;;  %v1655_v47 = vmul.f32 %v1299_v26, %v3869_v28  ;;  %v1656_v41 = vmul.f32 %v1299_v26, %v3872_v21 }
 0x157   : > { %v1888_v5 = vadd.f32 %v1887_v43, %v1653_v50  ;;  %v1903_v59 = vadd.f32 %v1902_v44, %v1654_v51 }
 0x158   : > { %v1307_v18 = vpop.permute.xlu1 %1306  ;;  %v1303_v42 = vpop.permute.xlu0 %1302 }
 0x159   : > { %2090 = vperm.xlu1 %3095, %v2012_v27   ;;  %v1657_v53 = vmul.f32 %v1303_v42, %v3878_v56  ;;  %v1658_v23 = vmul.f32 %v1303_v42, %v3881_v32  ;;  %v1889_v37 = vadd.f32 %v1888_v5, %v1655_v47  ;;  %v1904_v48 = vadd.f32 %v1903_v59, %v1656_v41 }
 0x15a   : > { %2085 = vperm.xlu0 %3094, %v2011_v52   ;;  %v1659_v62 = vmul.f32 %v1307_v18, %v3891_v24  ;;  %v1660_v13 = vmul.f32 %v1307_v18, %v3894_v19 }
 0x15b   : > { %v1890_v39 = vadd.f32 %v1889_v37, %v1657_v53  ;;  %v1905_v20 = vadd.f32 %v1904_v48, %v1658_v23 }
 0x15c   : > { %v1315_v15 = vpop.permute.xlu1 %1314  ;;  %v1311_v51 = vpop.permute.xlu0 %1310 }
 0x15d   : > { %v1663_v26 = vmul.f32 %v1315_v15, %v3732_v9  ;;  %v1664_v50 = vmul.f32 %v1315_v15, %v3735_v10  ;;  %v4065_v43 = vadd.f32 %v1890_v39, %v1659_v62  ;;  %v4067_v44 = vadd.f32 %v1905_v20, %v1660_v13 }
 0x15e   : > { %v1661_v27 = vmul.f32 %v1311_v51, %v3723_v2  ;;  %v1662_v52 = vmul.f32 %v1311_v51, %v3729_v6  ;;  %v1504_v51 = vmul.f32 %v3577_v8, %v3735_v10 }
 0x15f   : > { %4885 = vst [vmem:[#allocation34_spill] sm:$0xff] %v4065_v43  ;;  %4886 = vst [vmem:[#allocation35_spill] sm:$0xff] %v4067_v44  ;;  %v1505_v43 = vmul.f32 %v3565_v3, %v3748_v29 }
 0x160   : > { %v1907_v47 = vadd.f32 %v1663_v26, %v1661_v27  ;;  %v1922_v41 = vadd.f32 %v1664_v50, %v1662_v52  ;;  %v1323_v5 = vpop.permute.xlu1 %1322  ;;  %v1319_v59 = vpop.permute.xlu0 %1318  ;;  %v1503_v50 = vmul.f32 %v3577_v8, %v3732_v9 }
 0x161   : > { %v1665_v18 = vmul.f32 %v1319_v59, %v3748_v29  ;;  %v1666_v42 = vmul.f32 %v1319_v59, %v3751_v30  ;;  %v1667_v53 = vmul.f32 %v1323_v5, %v3759_v46  ;;  %v1668_v15 = vmul.f32 %v1323_v5, %v3762_v49 }
 0x162   : > { %v1501_v59 = vmul.f32 %v3567_v4, %v3723_v2 }
 0x163   : > { %v1908_v39 = vadd.f32 %v1907_v47, %v1665_v18  ;;  %v1923_v23 = vadd.f32 %v1922_v41, %v1666_v42  ;;  %v1502_v18 = vmul.f32 %v3567_v4, %v3729_v6  ;;  %v1506_v4 = vmul.f32 %v3565_v3, %v3751_v30 }
 0x164   : > { %v1331_v20 = vpop.permute.xlu1 %1330  ;;  %v1327_v37 = vpop.permute.xlu0 %1326  ;;  %v1508_v3 = vmul.f32 %v3575_v7, %v3762_v49 }
 0x165   : > { %v1669_v48 = vmul.f32 %v1327_v37, %v3768_v57  ;;  %v1670_v62 = vmul.f32 %v1327_v37, %v3771_v58  ;;  %v1909_v13 = vadd.f32 %v1908_v39, %v1667_v53  ;;  %v1924_v26 = vadd.f32 %v1923_v23, %v1668_v15 }
 0x166   : > { %v1671_v27 = vmul.f32 %v1331_v20, %v3781_v22  ;;  %v1672_v52 = vmul.f32 %v1331_v20, %v3784_v25  ;;  %v1757_v23 = vadd.f32 %v1503_v50, %v1501_v59  ;;  %v1772_v37 = vadd.f32 %v1504_v51, %v1502_v18 }
 0x167   : > { %v1910_v47 = vadd.f32 %v1909_v13, %v1669_v48  ;;  %v1925_v41 = vadd.f32 %v1924_v26, %v1670_v62 }
 0x168   : > { %v1339_v5 = vpop.permute.xlu1 %1338  ;;  %v1335_v42 = vpop.permute.xlu0 %1334 }
 0x169   : > { %v1673_v53 = vmul.f32 %v1335_v42, %v3790_v33  ;;  %v1674_v15 = vmul.f32 %v1335_v42, %v3793_v34  ;;  %v1911_v39 = vadd.f32 %v1910_v47, %v1671_v27  ;;  %v1926_v8 = vadd.f32 %v1925_v41, %v1672_v52 }
 0x16a   : > { %v1675_v20 = vmul.f32 %v1339_v5, %v3803_v63  ;;  %v1676_v48 = vmul.f32 %v1339_v5, %v3806_v1  ;;  %v1758_v52 = vadd.f32 %v1757_v23, %v1505_v43  ;;  %v1773_v47 = vadd.f32 %v1772_v37, %v1506_v4 }
 0x16b   : > { %v1912_v62 = vadd.f32 %v1911_v39, %v1673_v53  ;;  %v1927_v13 = vadd.f32 %v1926_v8, %v1674_v15  ;;  %v1507_v15 = vmul.f32 %v3575_v7, %v3759_v46  ;;  %v1510_v7 = vmul.f32 %v3587_v12, %v3771_v58 }
 0x16c   : > { %v1347_v26 = vpop.permute.xlu1 %1346  ;;  %v1343_v44 = vpop.permute.xlu0 %1342 }
 0x16d   : > { %v1677_v42 = vmul.f32 %v1343_v44, %v3812_v14  ;;  %v1678_v27 = vmul.f32 %v1343_v44, %v3815_v17  ;;  %v1913_v50 = vadd.f32 %v1912_v62, %v1675_v20  ;;  %v1928_v51 = vadd.f32 %v1927_v13, %v1676_v48 }
 0x16e   : > { %v1679_v41 = vmul.f32 %v1347_v26, %v3825_v55  ;;  %v1680_v5 = vmul.f32 %v1347_v26, %v3828_v45  ;;  %v1759_v37 = vadd.f32 %v1758_v52, %v1507_v15  ;;  %v1774_v20 = vadd.f32 %v1773_v47, %v1508_v3 }
 0x16f   : > { %v1914_v59 = vadd.f32 %v1913_v50, %v1677_v42  ;;  %v1929_v18 = vadd.f32 %v1928_v51, %v1678_v27  ;;  %v1509_v42 = vmul.f32 %v3587_v12, %v3768_v57  ;;  %v1512_v12 = vmul.f32 %v3585_v11, %v3784_v25 }
 0x170   : > { %v1355_v53 = vpop.permute.xlu1 %1354  ;;  %v1351_v39 = vpop.permute.xlu0 %1350 }
 0x171   : > { %v1681_v44 = vmul.f32 %v1351_v39, %v3834_v54  ;;  %v1682_v8 = vmul.f32 %v1351_v39, %v3837_v61  ;;  %v1915_v43 = vadd.f32 %v1914_v59, %v1679_v41  ;;  %v1930_v23 = vadd.f32 %v1929_v18, %v1680_v5 }
 0x172   : > { %v1683_v48 = vmul.f32 %v1355_v53, %v3847_v31  ;;  %v1684_v62 = vmul.f32 %v1355_v53, %v3850_v38  ;;  %v1760_v41 = vadd.f32 %v1759_v37, %v1509_v42  ;;  %v1775_v5 = vadd.f32 %v1774_v20, %v1510_v7 }
 0x173   : > { %v1916_v13 = vadd.f32 %v1915_v43, %v1681_v44  ;;  %v1931_v26 = vadd.f32 %v1930_v23, %v1682_v8  ;;  %v1511_v39 = vmul.f32 %v3585_v11, %v3781_v22  ;;  %v1513_v11 = vmul.f32 %v3597_v16, %v3790_v33 }
 0x174   : > { %v1363_v4 = vpop.permute.xlu1 %1362  ;;  %v1359_v27 = vpop.permute.xlu0 %1358 }
 0x175   : > { %v1685_v50 = vmul.f32 %v1359_v27, %v3856_v0  ;;  %v1686_v51 = vmul.f32 %v1359_v27, %v3859_v60  ;;  %v1917_v52 = vadd.f32 %v1916_v13, %v1683_v48  ;;  %v1932_v47 = vadd.f32 %v1931_v26, %v1684_v62 }
 0x176   : > { %v1687_v59 = vmul.f32 %v1363_v4, %v3869_v28  ;;  %v1688_v18 = vmul.f32 %v1363_v4, %v3872_v21  ;;  %v1761_v20 = vadd.f32 %v1760_v41, %v1511_v39  ;;  %v1776_v48 = vadd.f32 %v1775_v5, %v1512_v12 }
 0x177   : > { %v1918_v53 = vadd.f32 %v1917_v52, %v1685_v50  ;;  %v1933_v15 = vadd.f32 %v1932_v47, %v1686_v51  ;;  %v1514_v27 = vmul.f32 %v3597_v16, %v3793_v34  ;;  %v1535_v52 = vmul.f32 %v3645_v35, %v3732_v9 }
 0x178   : > { %v1371_v3 = vpop.permute.xlu1 %1370  ;;  %v1367_v44 = vpop.permute.xlu0 %1366  ;;  %v1536_v47 = vmul.f32 %v3645_v35, %v3735_v10  ;;  %v1533_v41 = vmul.f32 %v3647_v36, %v3723_v2  ;;  %v1534_v5 = vmul.f32 %v3647_v36, %v3729_v6  ;;  %v1537_v16 = vmul.f32 %v3657_v40, %v3748_v29  ;;  %v4887_v36 = vld [vmem:[#allocation8_spill] sm:$0xff] }
 0x179   : > { %v1689_v8 = vmul.f32 %v1367_v44, %v3878_v56  ;;  %v1690_v43 = vmul.f32 %v1367_v44, %v3881_v32  ;;  %v1919_v23 = vadd.f32 %v1918_v53, %v1687_v59  ;;  %v1934_v37 = vadd.f32 %v1933_v15, %v1688_v18 }
 0x17a   : > { %v1691_v62 = vmul.f32 %v1371_v3, %v3891_v24  ;;  %v1692_v13 = vmul.f32 %v1371_v3, %v3894_v19  ;;  %v1762_v59 = vadd.f32 %v1761_v20, %v1513_v11  ;;  %v1777_v18 = vadd.f32 %v1776_v48, %v1514_v27  ;;  %v4889_v11 = vld [vmem:[#allocation17_spill] sm:$0xff] }
 0x17b   : > { %v1920_v26 = vadd.f32 %v1919_v23, %v1689_v8  ;;  %v1935_v4 = vadd.f32 %v1934_v37, %v1690_v43  ;;  %v1538_v53 = vmul.f32 %v3657_v40, %v3751_v30  ;;  %v1515_v8 = vmul.f32 %v4887_v36, %v3803_v63 }
 0x17c   : > { %v1379_v42 = vpop.permute.xlu1 %1378  ;;  %v1516_v43 = vmul.f32 %v4887_v36, %v3806_v1  ;;  %v1787_v23 = vadd.f32 %v1535_v52, %v1533_v41  ;;  %v1802_v37 = vadd.f32 %v1536_v47, %v1534_v5  ;;  %v1539_v27 = vmul.f32 %v4889_v11, %v3759_v46  ;;  %v4890_v5 = vld [vmem:[#allocation19_spill] sm:$0xff] }
 0x17d   : > { %v1375_v7 = vpop.permute.xlu0 %1374  ;;  %v4127_v50 = vadd.f32 %v1920_v26, %v1691_v62  ;;  %v4129_v51 = vadd.f32 %v1935_v4, %v1692_v13  ;;  %v1695_v3 = vmul.f32 %v1379_v42, %v3732_v9  ;;  %v1696_v39 = vmul.f32 %v1379_v42, %v3735_v10  ;;  %v4888_v4 = vld [vmem:[#allocation10_spill] sm:$0xff] }
 0x17e   : > { %v1693_v35 = vmul.f32 %v1375_v7, %v3723_v2  ;;  %v1694_v12 = vmul.f32 %v1375_v7, %v3729_v6  ;;  %v1763_v9 = vadd.f32 %v1762_v59, %v1515_v8  ;;  %v1778_v48 = vadd.f32 %v1777_v18, %v1516_v43 }
 0x17f   : > { %v1788_v62 = vadd.f32 %v1787_v23, %v1537_v16  ;;  %v1803_v2 = vadd.f32 %v1802_v37, %v1538_v53  ;;  %v1517_v42 = vmul.f32 %v4888_v4, %v3812_v14  ;;  %v1518_v7 = vmul.f32 %v4888_v4, %v3815_v17 }
 0x180   : > { %v1387_v15 = vpop.permute.xlu1 %1386  ;;  %v1937_v13 = vadd.f32 %v1695_v3, %v1693_v35  ;;  %v1952_v6 = vadd.f32 %v1696_v39, %v1694_v12  ;;  %v1541_v59 = vmul.f32 %v4890_v5, %v3768_v57  ;;  %v1542_v18 = vmul.f32 %v4890_v5, %v3771_v58 }
 0x181   : > { %v1383_v44 = vpop.permute.xlu0 %1382  ;;  %v1764_v47 = vadd.f32 %v1763_v9, %v1517_v42  ;;  %v1779_v41 = vadd.f32 %v1778_v48, %v1518_v7  ;;  %v1789_v53 = vadd.f32 %v1788_v62, %v1539_v27  ;;  %v1699_v39 = vmul.f32 %v1387_v15, %v3759_v46 }
 0x182   : > { %v1697_v40 = vmul.f32 %v1383_v44, %v3748_v29  ;;  %v1698_v20 = vmul.f32 %v1383_v44, %v3751_v30  ;;  %v1540_v29 = vmul.f32 %v4889_v11, %v3762_v49  ;;  %v1700_v35 = vmul.f32 %v1387_v15, %v3762_v49  ;;  %v4891_v44 = vld [vmem:[#allocation9_spill] sm:$0xff]  ;;  %v4892_v15 = vld [vmem:[#allocation12_spill] sm:$0xff] }
 0x183   : > { %v1519_v36 = vmul.f32 %v4891_v44, %v3825_v55  ;;  %v1520_v8 = vmul.f32 %v4891_v44, %v3828_v45  ;;  %v1790_v46 = vadd.f32 %v1789_v53, %v1541_v59  ;;  %v4894_v11 = vld [vmem:[#allocation21_spill] sm:$0xff] }
 0x184   : > { %v1395_v10 = vpop.permute.xlu1 %1394  ;;  %v1938_v30 = vadd.f32 %v1937_v13, %v1697_v40  ;;  %v1953_v52 = vadd.f32 %v1952_v6, %v1698_v20  ;;  %v1804_v3 = vadd.f32 %v1803_v2, %v1540_v29  ;;  %v1521_v2 = vmul.f32 %v4892_v15, %v3834_v54  ;;  %v4893_v6 = vld [vmem:[#allocation18_spill] sm:$0xff] }
 0x185   : > { %v1391_v26 = vpop.permute.xlu0 %1390  ;;  %v1765_v20 = vadd.f32 %v1764_v47, %v1519_v36  ;;  %v1780_v9 = vadd.f32 %v1779_v41, %v1520_v8  ;;  %v1522_v13 = vmul.f32 %v4892_v15, %v3837_v61  ;;  %v1545_v27 = vmul.f32 %v4894_v11, %v3790_v33 }
 0x186   : > { %v1701_v43 = vmul.f32 %v1391_v26, %v3768_v57  ;;  %v1702_v23 = vmul.f32 %v1391_v26, %v3771_v58  ;;  %v1939_v37 = vadd.f32 %v1938_v30, %v1699_v39  ;;  %v1954_v40 = vadd.f32 %v1953_v52, %v1700_v35 }
 0x187   : > { %v1805_v62 = vadd.f32 %v1804_v3, %v1542_v18  ;;  %v1543_v57 = vmul.f32 %v4893_v6, %v3781_v22  ;;  %v1544_v58 = vmul.f32 %v4893_v6, %v3784_v25  ;;  %v1766_v42 = vadd.f32 %v1765_v20, %v1521_v2  ;;  %v4895_v18 = vld [vmem:[#allocation11_spill] sm:$0xff] }
 0x188   : > { %v1403_v16 = vpop.permute.xlu1 %1402  ;;  %v1940_v26 = vadd.f32 %v1939_v37, %v1701_v43  ;;  %v1955_v4 = vadd.f32 %v1954_v40, %v1702_v23  ;;  %v1781_v7 = vadd.f32 %v1780_v9, %v1522_v13  ;;  %v1546_v29 = vmul.f32 %v4894_v11, %v3793_v34  ;;  %v4896_v37 = vld [vmem:[#allocation14_spill] sm:$0xff] }
 0x189   : > { %v1399_v12 = vpop.permute.xlu0 %1398  ;;  %v1791_v52 = vadd.f32 %v1790_v46, %v1543_v57  ;;  %v1806_v47 = vadd.f32 %v1805_v62, %v1544_v58  ;;  %v1703_v41 = vmul.f32 %v1395_v10, %v3781_v22  ;;  %v1704_v5 = vmul.f32 %v1395_v10, %v3784_v25  ;;  %v4898_v62 = vld [vmem:[#allocation23_spill] sm:$0xff] }
 0x18a   : > { %v1523_v53 = vmul.f32 %v4895_v18, %v3847_v31  ;;  %v1524_v3 = vmul.f32 %v4895_v18, %v3850_v38  ;;  %v1705_v39 = vmul.f32 %v1399_v12, %v3790_v33  ;;  %v1706_v35 = vmul.f32 %v1399_v12, %v3793_v34  ;;  %v4897_v33 = vld [vmem:[#allocation20_spill] sm:$0xff]  ;;  %v3096_v18 = vld [vmem:[%s3361_s11 + $0x10] sm:$0xff] }
 0x18b   : > { %v1941_v44 = vadd.f32 %v1940_v26, %v1703_v41  ;;  %v1956_v36 = vadd.f32 %v1955_v4, %v1704_v5  ;;  %v1792_v22 = vadd.f32 %v1791_v52, %v1545_v27  ;;  %v1807_v25 = vadd.f32 %v1806_v47, %v1546_v29  ;;  %v4899_v26 = vld [vmem:[#allocation13_spill] sm:$0xff] }
 0x18c   : > { %v4173_v48 = vpop.permute.xlu1 %1410  ;;  %v1767_v8 = vadd.f32 %v1766_v42, %v1523_v53  ;;  %v1782_v43 = vadd.f32 %v1781_v7, %v1524_v3  ;;  %v1525_v31 = vmul.f32 %v4896_v37, %v3856_v0  ;;  %v1526_v38 = vmul.f32 %v4896_v37, %v3859_v60  ;;  %v3097_v53 = vld [vmem:[%s3361_s11 + $0x18] sm:$0xff]  ;;  %v4903_v37 = vld [vmem:[#allocation25_spill] sm:$0xff] }
 0x18d   : > { %v1407_v49 = vpop.permute.xlu0 %1406  ;;  %v1547_v40 = vmul.f32 %v4897_v33, %v3803_v63  ;;  %v1548_v34 = vmul.f32 %v4897_v33, %v3806_v1  ;;  %v1942_v12 = vadd.f32 %v1941_v44, %v1705_v39  ;;  %v1957_v20 = vadd.f32 %v1956_v36, %v1706_v35  ;;  %v3098_v39 = vld [vmem:[%s3361_s11] sm:$0xff]  ;;  %v3099_v35 = vld [vmem:[%s3361_s11 + $0x8] sm:$0xff]  ;;  %v4902_v36 = vld [vmem:[#allocation22_spill] sm:$0xff] }
 0x18e   : > { %v1768_v9 = vadd.f32 %v1767_v8, %v1525_v31  ;;  %v1783_v46 = vadd.f32 %v1782_v43, %v1526_v38  ;;  %v1549_v15 = vmul.f32 %v4898_v62, %v3812_v14  ;;  %v1550_v2 = vmul.f32 %v4898_v62, %v3815_v17 }
 0x18f   : > { %v1793_v13 = vadd.f32 %v1792_v22, %v1547_v40  ;;  %v1808_v60 = vadd.f32 %v1807_v25, %v1548_v34  ;;  %v1707_v6 = vmul.f32 %v1403_v16, %v3803_v63  ;;  %v1708_v57 = vmul.f32 %v1403_v16, %v3806_v1  ;;  %v4900_v63 = vld [vmem:[#allocation15_spill] sm:$0xff] }
 0x190   : > { %v4187_v30 = vpop.permute.xlu1 %1418  ;;  %v1527_v4 = vmul.f32 %v4899_v26, %v3869_v28  ;;  %v1528_v42 = vmul.f32 %v4899_v26, %v3872_v21  ;;  %v1709_v7 = vmul.f32 %v1407_v49, %v3812_v14  ;;  %v1710_v11 = vmul.f32 %v1407_v49, %v3815_v17  ;;  %v4901_v14 = vld [vmem:[#allocation16_spill] sm:$0xff] }
 0x191   : > { %v4191_v59 = vpop.permute.xlu0 %1414  ;;  %v1943_v27 = vadd.f32 %v1942_v12, %v1707_v6  ;;  %v1958_v29 = vadd.f32 %v1957_v20, %v1708_v57  ;;  %v4229_v1 = vmul.f32 %v4900_v63, %v3891_v24  ;;  %v4233_v28 = vmul.f32 %v4900_v63, %v3894_v19  ;;  %v4261_v12 = vld [vmem:[%s3361_s11 + $0x98] sm:$0xff]  ;;  %v4273_v6 = vld [vmem:[%s3361_s11 + $0xa8] sm:$0xff] }
 0x192   : > { %v1769_v16 = vadd.f32 %v1768_v9, %v1527_v4  ;;  %v1784_v52 = vadd.f32 %v1783_v46, %v1528_v42  ;;  %v1529_v47 = vmul.f32 %v4901_v14, %v3878_v56  ;;  %v1530_v17 = vmul.f32 %v4901_v14, %v3881_v32  ;;  %v3106_v4 = vld [vmem:[%s3361_s11 + $0x30] sm:$0xff]  ;;  %v4285_v14 = vld [vmem:[%s3361_s11 + $0xb8] sm:$0xff] }
 0x193   : > { %v1794_v49 = vadd.f32 %v1793_v13, %v1549_v15  ;;  %v1809_v41 = vadd.f32 %v1808_v60, %v1550_v2  ;;  %v1551_v8 = vmul.f32 %v4902_v36, %v3825_v55  ;;  %v1552_v56 = vmul.f32 %v4902_v36, %v3828_v45  ;;  %v4256_v45 = vld [vmem:[%s3361_s11 + $0x90] sm:$0xff]  ;;  %v3103_v15 = vld [vmem:[%s3361_s11 + $0x28] sm:$0xff]  ;;  %v4268_v13 = vld [vmem:[%s3361_s11 + $0xa0] sm:$0xff] }
 0x194   : > { %v4199_v23 = vpop.permute.xlu1 %1426  ;;  %v1944_v32 = vadd.f32 %v1943_v27, %v1709_v7  ;;  %v1959_v43 = vadd.f32 %v1958_v29, %v1710_v11  ;;  %v4247_v22 = vadd.f32 %v1769_v16, %v1529_v47  ;;  %v4249_v25 = vadd.f32 %v1784_v52, %v1530_v17  ;;  %v3107_v7 = vld [vmem:[%s3361_s11 + $0x38] sm:$0xff]  ;;  %v4280_v16 = vld [vmem:[%s3361_s11 + $0xb0] sm:$0xff]  ;;  %v4904_v52 = vld [vmem:[#allocation24_spill] sm:$0xff] }
 0x195   : > { %v4201_v10 = vpop.permute.xlu0 %1422  ;;  %v1553_v31 = vmul.f32 %v4903_v37, %v3834_v54  ;;  %v1554_v38 = vmul.f32 %v4903_v37, %v3837_v61  ;;  %v1795_v55 = vadd.f32 %v1794_v49, %v1551_v8  ;;  %v1810_v40 = vadd.f32 %v1809_v41, %v1552_v56  ;;  %v3102_v61 = vld [vmem:[%s3361_s11 + $0x20] sm:$0xff]  ;;  %v3115_v37 = vld [vmem:[%s3361_s11 + $0x58] sm:$0xff] }
 0x196   : > { %v1711_v34 = vmul.f32 %v4256_v45, %v4173_v48  ;;  %v1712_v20 = vmul.f32 %v4261_v12, %v4173_v48  ;;  %v1713_v60 = vmul.f32 %v4268_v13, %v4191_v59  ;;  %v1714_v48 = vmul.f32 %v4273_v6, %v4191_v59  ;;  %v3110_v41 = vld [vmem:[%s3361_s11 + $0x40] sm:$0xff] }
 0x197   : > { %v1556_v59 = vmul.f32 %v4285_v14, %v4904_v52  ;;  %v1796_v47 = vadd.f32 %v1795_v55, %v1553_v31  ;;  %v1811_v17 = vadd.f32 %v1810_v40, %v1554_v38 }
 0x198   : > { %v4215_v0 = vpop.permute.xlu1 %1434  ;;  %v1945_v57 = vadd.f32 %v1944_v32, %v1711_v34  ;;  %v1960_v26 = vadd.f32 %v1959_v43, %v1712_v20  ;;  %v3114_v32 = vld [vmem:[%s3361_s11 + $0x50] sm:$0xff]  ;;  %v1715_v20 = vmul.f32 %v4280_v16, %v4187_v30 }
 0x199   : > { %v4219_v58 = vpop.permute.xlu0 %1430  ;;  %v1812_v34 = vadd.f32 %v1811_v17, %v1556_v59 }
 0x19a   : > { %v1946_v8 = vadd.f32 %v1945_v57, %v1713_v60  ;;  %v1961_v56 = vadd.f32 %v1960_v26, %v1714_v48 }
 0x19c   : > { %v1443_v21 = vpop.permute.xlu1 %1442  ;;  %v1947_v26 = vadd.f32 %v1946_v8, %v1715_v20  ;;  %v3124_v8 = vld [vmem:[%s3361_s11 + $0xe0] sm:$0xff] }
 0x19d   : > { %v1439_v5 = vpop.permute.xlu0 %1438  ;;  %v1727_v24 = vmul.f32 %v3096_v18, %v1443_v21  ;;  %v1728_v3 = vmul.f32 %v3097_v53, %v1443_v21  ;;  %v1555_v21 = vmul.f32 %v4280_v16, %v4904_v52  ;;  %v3111_v18 = vld [vmem:[%s3361_s11 + $0x48] sm:$0xff]  ;;  %v3120_v52 = vld [vmem:[%s3361_s11 + $0xd0] sm:$0xff] }
 0x19e   : > { %v1725_v19 = vmul.f32 %v3098_v39, %v1439_v5  ;;  %v1726_v44 = vmul.f32 %v3099_v35, %v1439_v5  ;;  %v4292_v39 = vld [vmem:[%s3361_s11 + $0xc0] sm:$0xff] }
 0x19f   : > { %v1797_v40 = vadd.f32 %v1796_v47, %v1555_v21  ;;  %v1717_v48 = vmul.f32 %v4292_v39, %v4201_v10  ;;  %v4906_v21 = vld [vmem:[#allocation26_spill] sm:$0xff]  ;;  %v3121_v47 = vld [vmem:[%s3361_s11 + $0xd8] sm:$0xff] }
 0x1a0   : > { %v1451_v33 = vpop.permute.xlu1 %1450  ;;  %v1967_v9 = vadd.f32 %v1727_v24, %v1725_v19  ;;  %v1982_v46 = vadd.f32 %v1728_v3, %v1726_v44  ;;  %v4905_v19 = vld [vmem:[#allocation27_spill] sm:$0xff]  ;;  %v4297_v44 = vld [vmem:[%s3361_s11 + $0xc8] sm:$0xff]  ;;  %v1559_v59 = vmul.f32 %v3120_v52, %v4906_v21  ;;  %v1560_v17 = vmul.f32 %v3121_v47, %v4906_v21 }
 0x1a1   : > { %v1447_v54 = vpop.permute.xlu0 %1446  ;;  %v1731_v42 = vmul.f32 %v3106_v4, %v1451_v33  ;;  %v1732_v11 = vmul.f32 %v3107_v7, %v1451_v33  ;;  %v1557_v35 = vmul.f32 %v4292_v39, %v4905_v19  ;;  %v1558_v36 = vmul.f32 %v4297_v44, %v4905_v19  ;;  %v3119_v7 = vld [vmem:[%s3361_s11 + $0x78] sm:$0xff] }
 0x1a2   : > { %v1729_v62 = vmul.f32 %v3102_v61, %v1447_v54  ;;  %v1730_v2 = vmul.f32 %v3103_v15, %v1447_v54  ;;  %v1716_v54 = vmul.f32 %v4285_v14, %v4187_v30  ;;  %v1718_v57 = vmul.f32 %v4297_v44, %v4201_v10 }
 0x1a3   : > { %v1798_v10 = vadd.f32 %v1797_v40, %v1557_v35 }
 0x1a4   : > { %v1968_v27 = vadd.f32 %v1967_v9, %v1729_v62  ;;  %v1983_v29 = vadd.f32 %v1982_v46, %v1730_v2  ;;  %v1459_v63 = vpop.permute.xlu1 %1458  ;;  %v3116_v46 = vld [vmem:[%s3361_s11 + $0x60] sm:$0xff]  ;;  %v3117_v62 = vld [vmem:[%s3361_s11 + $0x68] sm:$0xff]  ;;  %v1962_v4 = vadd.f32 %v1961_v56, %v1716_v54  ;;  %v1719_v54 = vmul.f32 %v3120_v52, %v4199_v23 }
 0x1a5   : > { %v1455_v49 = vpop.permute.xlu0 %1454  ;;  %v1735_v43 = vmul.f32 %v3114_v32, %v1459_v63  ;;  %v1736_v31 = vmul.f32 %v3115_v37, %v1459_v63  ;;  %v4907_v56 = vld [vmem:[#allocation29_spill] sm:$0xff] }
 0x1a6   : > { %v1733_v5 = vmul.f32 %v3110_v41, %v1455_v49  ;;  %v1734_v24 = vmul.f32 %v3111_v18, %v1455_v49  ;;  %v1969_v53 = vadd.f32 %v1968_v27, %v1731_v42  ;;  %v1984_v3 = vadd.f32 %v1983_v29, %v1732_v11  ;;  %v3118_v42 = vld [vmem:[%s3361_s11 + $0x70] sm:$0xff] }
 0x1a7   : > { %v1813_v49 = vadd.f32 %v1812_v34, %v1558_v36  ;;  %v1561_v32 = vmul.f32 %v3124_v8, %v4907_v56  ;;  %v1799_v34 = vadd.f32 %v1798_v10, %v1559_v59  ;;  %v3126_v10 = vld [vmem:[%s3361_s11 + $0xf0] sm:$0xff] }
 0x1a8   : > { %v1970_v38 = vadd.f32 %v1969_v53, %v1733_v5  ;;  %v1985_v33 = vadd.f32 %v1984_v3, %v1734_v24  ;;  %v1467_v55 = vpop.permute.xlu1 %1466  ;;  %v3122_v5 = vld [vmem:[%s3361_s11 + $0x80] sm:$0xff]  ;;  %v3123_v24 = vld [vmem:[%s3361_s11 + $0x88] sm:$0xff] }
 0x1a9   : > { %v1463_v9 = vpop.permute.xlu0 %1462  ;;  %v1739_v30 = vmul.f32 %v3118_v42, %v1467_v55  ;;  %v1740_v11 = vmul.f32 %v3119_v7, %v1467_v55  ;;  %v1814_v20 = vadd.f32 %v1813_v49, %v1560_v17  ;;  %v3127_v49 = vld [vmem:[%s3361_s11 + $0xf8] sm:$0xff] }
 0x1aa   : > { %v1737_v61 = vmul.f32 %v3116_v46, %v1463_v9  ;;  %v1738_v15 = vmul.f32 %v3117_v62, %v1463_v9  ;;  %v1971_v2 = vadd.f32 %v1970_v38, %v1735_v43  ;;  %v1986_v60 = vadd.f32 %v1985_v33, %v1736_v31  ;;  %v3125_v43 = vld [vmem:[%s3361_s11 + $0xe8] sm:$0xff]  ;;  %s2907_s11 = sshll.u32 %s3357_s5, 6 }
 0x1ab   : > { %v1562_v37 = vmul.f32 %v3125_v43, %v4907_v56  ;;  %v1948_v31 = vadd.f32 %v1947_v26, %v1717_v48  ;;  %v1963_v38 = vadd.f32 %v1962_v4, %v1718_v57  ;;  %v1720_v9 = vmul.f32 %v3121_v47, %v4199_v23  ;;  %s4729_s6 = scalar_lea.vmem [#allocation5], %s2907_s11 }
 0x1ac   : > { %v1972_v27 = vadd.f32 %v1971_v2, %v1737_v61  ;;  %v1987_v29 = vadd.f32 %v1986_v60, %v1738_v15  ;;  %v1475_v63 = vpop.permute.xlu1 %1474  ;;  %s2826_s7 = sshll.u32 %s4729_s6, 4  ;;  %s4753_s7 = int_to_ptr.vmem [resolvable:$true] %s2826_s7 }
 0x1ad   : > { %v1471_v41 = vpop.permute.xlu0 %1470  ;;  %v1743_v33 = vmul.f32 %v4256_v45, %v1475_v63  ;;  %v1744_v35 = vmul.f32 %v4261_v12, %v1475_v63  ;;  %v1721_v45 = vmul.f32 %v3124_v8, %v4219_v58  ;;  %v1722_v12 = vmul.f32 %v3125_v43, %v4219_v58  ;;  %s3158_s20 = scalar_lea.vmem %s4753_s7, 1024  ;;  %p3165_p8 = scmp.lt.s32.totalorder %s4753_s7, %s3163_s22 }
 0x1ae   : > { %v1741_v18 = vmul.f32 %v3122_v5, %v1471_v41  ;;  %v1742_v53 = vmul.f32 %v3123_v24, %v1471_v41  ;;  %v1973_v3 = vadd.f32 %v1972_v27, %v1739_v30  ;;  %v1988_v19 = vadd.f32 %v1987_v29, %v1740_v11  ;;  %p3159_p6 = scmp.ne.s32.totalorder %s4753_s7, %s3158_s20  ;;  %p3166_p10 = scmp.lt.s32.totalorder %s3164_s26, %s3158_s20 }
 0x1af   : > { %v1949_v60 = vadd.f32 %v1948_v31, %v1719_v54  ;;  %v1964_v48 = vadd.f32 %v1963_v38, %v1720_v9  ;;  %v1800_v11 = vadd.f32 %v1799_v34, %v1561_v32  ;;  %v1815_v27 = vadd.f32 %v1814_v20, %v1562_v37  ;;  %v4911_v54 = vld [vmem:[#allocation35_spill] sm:$0xff] }
 0x1b0   : > { %v1974_v36 = vadd.f32 %v1973_v3, %v1741_v18  ;;  %v1989_v55 = vadd.f32 %v1988_v19, %v1742_v53  ;;  %v1483_v40 = vpop.permute.xlu1 %1482  ;;  %p3160_p12 = pnand %p3159_p6, %p4915_p11  ;;  %p3167_p0 = por %p3166_p10, %p3165_p8 }
 0x1b1   : > { %v1479_v46 = vpop.permute.xlu0 %1478  ;;  %v1747_v57 = vmul.f32 %v4280_v16, %v1483_v40  ;;  %v1748_v26 = vmul.f32 %v4285_v14, %v1483_v40  ;;  %v1950_v29 = vadd.f32 %v1949_v60, %v1721_v45  ;;  %v1965_v63 = vadd.f32 %v1964_v48, %v1722_v12  ;;  %v4913_v60 = vld [vmem:[#allocation32_spill] sm:$0xff] }
 0x1b2   : > { %v1745_v61 = vmul.f32 %v4268_v13, %v1479_v46  ;;  %v1746_v62 = vmul.f32 %v4273_v6, %v1479_v46  ;;  %v1975_v15 = vadd.f32 %v1974_v36, %v1743_v33  ;;  %v1990_v2 = vadd.f32 %v1989_v55, %v1744_v35  ;;  %v4910_v36 = vld [vmem:[#allocation33_spill] sm:$0xff]  ;;  %p3161_p13 = pneg %p3160_p12 }
 0x1b3   : > { %v4337_v13 = vadd.f32 %v4247_v22, %v4229_v1  ;;  %v4341_v6 = vadd.f32 %v4249_v25, %v4233_v28  ;;  %v4908_v28 = vld [vmem:[#allocation28_spill] sm:$0xff] }
 0x1b4   : > { %v1976_v4 = vadd.f32 %v1975_v15, %v1745_v61  ;;  %v1991_v42 = vadd.f32 %v1990_v2, %v1746_v62  ;;  %v1491_v23 = vpop.permute.xlu1 %1490  ;;  %v1563_v25 = vmul.f32 %v3126_v10, %v4908_v28  ;;  %v1564_v41 = vmul.f32 %v3127_v49, %v4908_v28  ;;  %v4912_v2 = vld [vmem:[#allocation30_spill] sm:$0xff]  ;;  %p3168_p2 = pnand %p3167_p0, %p3161_p13 }
 0x1b5   : > { %v1487_v30 = vpop.permute.xlu0 %1486  ;;  %v1751_v21 = vmul.f32 %v3120_v52, %v1491_v23  ;;  %v1752_v1 = vmul.f32 %v3121_v47, %v1491_v23 }
 0x1b6   : > { %v1749_v58 = vmul.f32 %v4292_v39, %v1487_v30  ;;  %v1750_v16 = vmul.f32 %v4297_v44, %v1487_v30  ;;  %v1977_v7 = vadd.f32 %v1976_v4, %v1747_v57  ;;  %v1992_v14 = vadd.f32 %v1991_v42, %v1748_v26  ;;  %v4914_v57 = vld [vmem:[#allocation34_spill] sm:$0xff] }
 0x1b7   : > { %v1723_v39 = vmul.f32 %v3126_v10, %v4215_v0  ;;  %v1724_v44 = vmul.f32 %v3127_v49, %v4215_v0  ;;  %v4351_v52 = vadd.f32 %v1800_v11, %v1563_v25  ;;  %v4353_v47 = vadd.f32 %v1815_v27, %v1564_v41 }
 0x1b8   : > { %v1978_v22 = vadd.f32 %v1977_v7, %v1749_v58  ;;  %v1993_v59 = vadd.f32 %v1992_v14, %v1750_v16  ;;  %v1499_v17 = vpop.permute.xlu1 %1498 }
 0x1b9   : > { %v1495_v5 = vpop.permute.xlu0 %1494  ;;  %v4355_v19 = vadd.f32 %v1950_v29, %v1723_v39  ;;  %v4357_v56 = vadd.f32 %v1965_v63, %v1724_v44  ;;  %v1755_v32 = vmul.f32 %v3126_v10, %v1499_v17  ;;  %v1756_v37 = vmul.f32 %v3127_v49, %v1499_v17 }
 0x1ba   : > { %v1753_v18 = vmul.f32 %v3124_v8, %v1495_v5  ;;  %v1754_v24 = vmul.f32 %v3125_v43, %v1495_v5  ;;  %v1979_v53 = vadd.f32 %v1978_v22, %v1751_v21  ;;  %v1994_v3 = vadd.f32 %v1993_v59, %v1752_v1  ;;  %v4909_v43 = vld [vmem:[#allocation31_spill] sm:$0xff] }
 0x1bc   : > { %v1980_v31 = vadd.f32 %v1979_v53, %v1753_v18  ;;  %v1995_v38 = vadd.f32 %v1994_v3, %v1754_v24  ;;  %v2021_v33 = vpop.permute.xlu1 %2020 }
 0x1bd   : > { %v2094_v0 = vmul.f32 %v2021_v33, %v4341_v6  ;;  %v2110_v8 = vmul.f32 %v2021_v33, %v4353_v47  ;;  %v2126_v35 = vmul.f32 %v2021_v33, %v4909_v43  ;;  %v2142_v55 = vmul.f32 %v2021_v33, %v4910_v36  ;;  %v2016_v40 = vpop.permute.xlu0 %2015 }
 0x1be   : > { %v4363_v34 = vadd.f32 %v1980_v31, %v1755_v32  ;;  %v4365_v20 = vadd.f32 %v1995_v38, %v1756_v37  ;;  %v2158_v9 = vmul.f32 %v2021_v33, %v4911_v54  ;;  %v2174_v46 = vmul.f32 %v2021_v33, %v4129_v51 }
 0x1bf   : > { %v2190_v61 = vmul.f32 %v2021_v33, %v4357_v56  ;;  %v2093_v62 = vmul.f32 %v2016_v40, %v4337_v13  ;;  %v2109_v15 = vmul.f32 %v2016_v40, %v4351_v52  ;;  %v2125_v45 = vmul.f32 %v2016_v40, %v4912_v2 }
 0x1c0   : > { %v2206_v12 = vmul.f32 %v2021_v33, %v4365_v20  ;;  %v2141_v48 = vmul.f32 %v2016_v40, %v4913_v60  ;;  %v2157_v26 = vmul.f32 %v2016_v40, %v4914_v57  ;;  %v2173_v4 = vmul.f32 %v2016_v40, %v4127_v50 }
 0x1c1   : > { %v2189_v42 = vmul.f32 %v2016_v40, %v4355_v19  ;;  %v2205_v23 = vmul.f32 %v2016_v40, %v4363_v34  ;;  %v2221_v30 = vadd.f32 %v2094_v0, %v2093_v62  ;;  %v2277_v58 = vadd.f32 %v2110_v8, %v2109_v15 }
 0x1c2   : > { %v2333_v16 = vadd.f32 %v2126_v35, %v2125_v45  ;;  %v2389_v7 = vadd.f32 %v2142_v55, %v2141_v48  ;;  %v2445_v14 = vadd.f32 %v2158_v9, %v2157_v26  ;;  %v2501_v11 = vadd.f32 %v2174_v46, %v2173_v4 }
 0x1c3   : > { %v2222_v27 = vrot.slane %v2221_v30, 4  ;;  %v2278_v29 = vrot.slane %v2277_v58, 4  ;;  %v2557_v63 = vadd.f32 %v2190_v61, %v2189_v42  ;;  %v2613_v21 = vadd.f32 %v2206_v12, %v2205_v23  ;;  %v2031_v42 = vpop.permute.xlu1 %2030 }
 0x1c4   : > { %v2334_v1 = vrot.slane %v2333_v16, 4  ;;  %v2390_v22 = vrot.slane %v2389_v7, 4  ;;  %v2446_v59 = vrot.slane %v2445_v14, 4  ;;  %v2502_v17 = vrot.slane %v2501_v11, 4 }
 0x1c5   : > { %v2223_v10 = vadd.f32 %v2222_v27, %v2221_v30  ;;  %v2279_v28 = vadd.f32 %v2278_v29, %v2277_v58  ;;  %v2558_v25 = vrot.slane %v2557_v63, 4  ;;  %v2614_v49 = vrot.slane %v2613_v21, 4 }
 0x1c6   : > { %v2335_v41 = vadd.f32 %v2334_v1, %v2333_v16  ;;  %v2391_v39 = vadd.f32 %v2390_v22, %v2389_v7  ;;  %v2447_v44 = vadd.f32 %v2446_v59, %v2445_v14  ;;  %v2503_v5 = vadd.f32 %v2502_v17, %v2501_v11  ;;  %v2026_v11 = vpop.permute.xlu0 %2025 }
 0x1c7   : > { %v2224_v18 = vrot.slane %v2223_v10, 2  ;;  %v2280_v24 = vrot.slane %v2279_v28, 2  ;;  %v2559_v53 = vadd.f32 %v2558_v25, %v2557_v63  ;;  %v2615_v3 = vadd.f32 %v2614_v49, %v2613_v21 }
 0x1c8   : > { %v2336_v32 = vrot.slane %v2335_v41, 2  ;;  %v2392_v37 = vrot.slane %v2391_v39, 2  ;;  %v2448_v31 = vrot.slane %v2447_v44, 2  ;;  %v2504_v38 = vrot.slane %v2503_v5, 2 }
 0x1c9   : > { %v2225_v33 = vadd.f32 %v2224_v18, %v2223_v10  ;;  %v2281_v0 = vadd.f32 %v2280_v24, %v2279_v28  ;;  %v2560_v8 = vrot.slane %v2559_v53, 2  ;;  %v2616_v35 = vrot.slane %v2615_v3, 2 }
 0x1ca   : > { %v2337_v55 = vadd.f32 %v2336_v32, %v2335_v41  ;;  %v2393_v40 = vadd.f32 %v2392_v37, %v2391_v39  ;;  %v2449_v9 = vadd.f32 %v2448_v31, %v2447_v44  ;;  %v2505_v46 = vadd.f32 %v2504_v38, %v2503_v5 }
 0x1cb   : > { %v2226_v61 = vrot.slane %v2225_v33, 1  ;;  %v2282_v62 = vrot.slane %v2281_v0, 1  ;;  %v4379_v15 = vadd.f32 %v2560_v8, %v2559_v53  ;;  %v4381_v45 = vadd.f32 %v2616_v35, %v2615_v3 }
 0x1cc   : > { %v2338_v12 = vrot.slane %v2337_v55, 1  ;;  %v2394_v48 = vrot.slane %v2393_v40, 1  ;;  %v2450_v26 = vrot.slane %v2449_v9, 1  ;;  %v2506_v4 = vrot.slane %v2505_v46, 1 }
 0x1cd   : > { %v4383_v23 = vadd.f32 %v2226_v61, %v2225_v33  ;;  %v4385_v30 = vadd.f32 %v2282_v62, %v2281_v0  ;;  %v2562_v7 = vrot.slane %v4379_v15, 1  ;;  %v2618_v14 = vrot.slane %v4381_v45, 1 }
 0x1ce   : > { %v4387_v58 = vadd.f32 %v2338_v12, %v2337_v55  ;;  %v4389_v16 = vadd.f32 %v2394_v48, %v2393_v40  ;;  %v4393_v27 = vadd.f32 %v2450_v26, %v2449_v9  ;;  %v4395_v29 = vadd.f32 %v2506_v4, %v2505_v46 }
 0x1cf   : > { %v2096_v63 = vmul.f32 %v2031_v42, %v4341_v6  ;;  %v2112_v21 = vmul.f32 %v2031_v42, %v4353_v47  ;;  %v2128_v1 = vmul.f32 %v2031_v42, %v4909_v43  ;;  %v2144_v22 = vmul.f32 %v2031_v42, %v4910_v36 }
 0x1d0   : > { %v2160_v59 = vmul.f32 %v2031_v42, %v4911_v54  ;;  %v2176_v17 = vmul.f32 %v2031_v42, %v4129_v51  ;;  %v2192_v10 = vmul.f32 %v2031_v42, %v4357_v56  ;;  %v2208_v28 = vmul.f32 %v2031_v42, %v4365_v20 }
 0x1d1   : > { %v2095_v25 = vmul.f32 %v2026_v11, %v4337_v13  ;;  %v2111_v49 = vmul.f32 %v2026_v11, %v4351_v52  ;;  %v2127_v41 = vmul.f32 %v2026_v11, %v4912_v2  ;;  %v2143_v39 = vmul.f32 %v2026_v11, %v4913_v60 }
 0x1d2   : > { %v2159_v44 = vmul.f32 %v2026_v11, %v4914_v57  ;;  %v2175_v5 = vmul.f32 %v2026_v11, %v4127_v50  ;;  %v2191_v18 = vmul.f32 %v2026_v11, %v4355_v19  ;;  %v2207_v24 = vmul.f32 %v2026_v11, %v4363_v34 }
 0x1d3   : > { %v2228_v53 = vadd.f32 %v2096_v63, %v2095_v25  ;;  %v2284_v3 = vadd.f32 %v2112_v21, %v2111_v49  ;;  %v2340_v32 = vadd.f32 %v2128_v1, %v2127_v41  ;;  %v2396_v37 = vadd.f32 %v2144_v22, %v2143_v39 }
 0x1d4   : > { %v2452_v31 = vadd.f32 %v2160_v59, %v2159_v44  ;;  %v2508_v38 = vadd.f32 %v2176_v17, %v2175_v5  ;;  %v2564_v8 = vadd.f32 %v2192_v10, %v2191_v18  ;;  %v2620_v35 = vadd.f32 %v2208_v28, %v2207_v24 }
 0x1d5   : > { %v2229_v33 = vrot.slane %v2228_v53, 4  ;;  %v2285_v0 = vrot.slane %v2284_v3, 4  ;;  %v2341_v55 = vrot.slane %v2340_v32, 4  ;;  %v2397_v40 = vrot.slane %v2396_v37, 4 }
 0x1d6   : > { %v2453_v9 = vrot.slane %v2452_v31, 4  ;;  %v2509_v46 = vrot.slane %v2508_v38, 4  ;;  %v2565_v12 = vrot.slane %v2564_v8, 4  ;;  %v2621_v48 = vrot.slane %v2620_v35, 4 }
 0x1d7   : > { %v2230_v61 = vadd.f32 %v2229_v33, %v2228_v53  ;;  %v2286_v62 = vadd.f32 %v2285_v0, %v2284_v3  ;;  %v2342_v26 = vadd.f32 %v2341_v55, %v2340_v32  ;;  %v2398_v4 = vadd.f32 %v2397_v40, %v2396_v37 }
 0x1d8   : > { %v2454_v42 = vadd.f32 %v2453_v9, %v2452_v31  ;;  %v2510_v11 = vadd.f32 %v2509_v46, %v2508_v38  ;;  %v2566_v1 = vadd.f32 %v2565_v12, %v2564_v8  ;;  %v2622_v22 = vadd.f32 %v2621_v48, %v2620_v35  ;;  %v2041_v12 = vpop.permute.xlu1 %2040 }
 0x1d9   : > { %v2231_v63 = vrot.slane %v2230_v61, 2  ;;  %v2287_v21 = vrot.slane %v2286_v62, 2  ;;  %v2343_v59 = vrot.slane %v2342_v26, 2  ;;  %v2399_v17 = vrot.slane %v2398_v4, 2 }
 0x1da   : > { %v2455_v10 = vrot.slane %v2454_v42, 2  ;;  %v2511_v28 = vrot.slane %v2510_v11, 2  ;;  %v2567_v41 = vrot.slane %v2566_v1, 2  ;;  %v2623_v39 = vrot.slane %v2622_v22, 2 }
 0x1db   : > { %v2232_v25 = vadd.f32 %v2231_v63, %v2230_v61  ;;  %v2288_v49 = vadd.f32 %v2287_v21, %v2286_v62  ;;  %v2344_v44 = vadd.f32 %v2343_v59, %v2342_v26  ;;  %v2400_v5 = vadd.f32 %v2399_v17, %v2398_v4 }
 0x1dc   : > { %v2456_v18 = vadd.f32 %v2455_v10, %v2454_v42  ;;  %v2512_v24 = vadd.f32 %v2511_v28, %v2510_v11  ;;  %v2568_v32 = vadd.f32 %v2567_v41, %v2566_v1  ;;  %v2624_v37 = vadd.f32 %v2623_v39, %v2622_v22 }
 0x1dd   : > { %v2233_v53 = vrot.slane %v2232_v25, 1  ;;  %v2289_v3 = vrot.slane %v2288_v49, 1  ;;  %v2345_v31 = vrot.slane %v2344_v44, 1  ;;  %v2401_v38 = vrot.slane %v2400_v5, 1 }
 0x1de   : > { %v2457_v33 = vrot.slane %v2456_v18, 1  ;;  %v2513_v0 = vrot.slane %v2512_v24, 1  ;;  %v2569_v55 = vrot.slane %v2568_v32, 1  ;;  %v2625_v40 = vrot.slane %v2624_v37, 1 }
 0x1df   : > { %v2234_v8 = vadd.f32 %v2233_v53, %v2232_v25  ;;  %v2290_v35 = vadd.f32 %v2289_v3, %v2288_v49  ;;  %v2346_v9 = vadd.f32 %v2345_v31, %v2344_v44  ;;  %v2402_v46 = vadd.f32 %v2401_v38, %v2400_v5 }
 0x1e0   : > { %v2458_v61 = vadd.f32 %v2457_v33, %v2456_v18  ;;  %v2514_v62 = vadd.f32 %v2513_v0, %v2512_v24  ;;  %v4416_v48 = vadd.f32 %v2562_v7, %v4379_v15  ;;  %v4421_v26 = vadd.f32 %v2618_v14, %v4381_v45  ;;  %v2036_v7 = vpop.permute.xlu0 %2035 }
 0x1e1   : > { %v4423_v4 = vadd.f32 %v2569_v55, %v2568_v32  ;;  %v4425_v42 = vadd.f32 %v2625_v40, %v2624_v37  ;;  %v4429_v11 = vsel %vm2733_vm0, %v2346_v9, %v4387_v58  ;;  %v4433_v63 = vsel %vm2733_vm0, %v2402_v46, %v4389_v16 }
 0x1e2   : > { %v4437_v15 = vsel %vm2733_vm0, %v2458_v61, %v4393_v27  ;;  %v4441_v45 = vsel %vm2733_vm0, %v2514_v62, %v4395_v29  ;;  %v4445_v14 = vsel %vm2733_vm0, %v2234_v8, %v4383_v23  ;;  %v4449_v58 = vsel %vm2733_vm0, %v2290_v35, %v4385_v30 }
 0x1e3   : > { %v2098_v16 = vmul.f32 %v2041_v12, %v4341_v6  ;;  %v2114_v21 = vmul.f32 %v2041_v12, %v4353_v47  ;;  %v2130_v27 = vmul.f32 %v2041_v12, %v4909_v43  ;;  %v2146_v1 = vmul.f32 %v2041_v12, %v4910_v36 }
 0x1e4   : > { %v2162_v29 = vmul.f32 %v2041_v12, %v4911_v54  ;;  %v2178_v22 = vmul.f32 %v2041_v12, %v4129_v51  ;;  %v2194_v59 = vmul.f32 %v2041_v12, %v4357_v56  ;;  %v2210_v23 = vmul.f32 %v2041_v12, %v4365_v20 }
 0x1e5   : > { %v2097_v17 = vmul.f32 %v2036_v7, %v4337_v13  ;;  %v2113_v30 = vmul.f32 %v2036_v7, %v4351_v52  ;;  %v2129_v10 = vmul.f32 %v2036_v7, %v4912_v2  ;;  %v2145_v28 = vmul.f32 %v2036_v7, %v4913_v60 }
 0x1e6   : > { %v2161_v25 = vmul.f32 %v2036_v7, %v4914_v57  ;;  %v2177_v49 = vmul.f32 %v2036_v7, %v4127_v50  ;;  %v2193_v41 = vmul.f32 %v2036_v7, %v4355_v19  ;;  %v2209_v39 = vmul.f32 %v2036_v7, %v4363_v34 }
 0x1e7   : > { %v2235_v44 = vadd.f32 %v2098_v16, %v2097_v17  ;;  %v2291_v5 = vadd.f32 %v2114_v21, %v2113_v30  ;;  %v2347_v18 = vadd.f32 %v2130_v27, %v2129_v10  ;;  %v2403_v24 = vadd.f32 %v2146_v1, %v2145_v28 }
 0x1e8   : > { %v2459_v53 = vadd.f32 %v2162_v29, %v2161_v25  ;;  %v2515_v3 = vadd.f32 %v2178_v22, %v2177_v49  ;;  %v2571_v31 = vadd.f32 %v2194_v59, %v2193_v41  ;;  %v2627_v38 = vadd.f32 %v2210_v23, %v2209_v39 }
 0x1e9   : > { %v2236_v32 = vrot.slane %v2235_v44, 4  ;;  %v2292_v37 = vrot.slane %v2291_v5, 4  ;;  %v2348_v33 = vrot.slane %v2347_v18, 4  ;;  %v2404_v0 = vrot.slane %v2403_v24, 4 }
 0x1ea   : > { %v2460_v8 = vrot.slane %v2459_v53, 4  ;;  %v2516_v35 = vrot.slane %v2515_v3, 4  ;;  %v2572_v9 = vrot.slane %v2571_v31, 4  ;;  %v2628_v46 = vrot.slane %v2627_v38, 4 }
 0x1eb   : > { %v2237_v55 = vadd.f32 %v2236_v32, %v2235_v44  ;;  %v2293_v40 = vadd.f32 %v2292_v37, %v2291_v5  ;;  %v2349_v61 = vadd.f32 %v2348_v33, %v2347_v18  ;;  %v2405_v62 = vadd.f32 %v2404_v0, %v2403_v24 }
 0x1ec   : > { %v2461_v12 = vadd.f32 %v2460_v8, %v2459_v53  ;;  %v2517_v7 = vadd.f32 %v2516_v35, %v2515_v3  ;;  %v2573_v27 = vadd.f32 %v2572_v9, %v2571_v31  ;;  %v2629_v1 = vadd.f32 %v2628_v46, %v2627_v38  ;;  %v2051_v9 = vpop.permute.xlu1 %2050 }
 0x1ed   : > { %v2238_v16 = vrot.slane %v2237_v55, 2  ;;  %v2294_v21 = vrot.slane %v2293_v40, 2  ;;  %v2350_v29 = vrot.slane %v2349_v61, 2  ;;  %v2406_v22 = vrot.slane %v2405_v62, 2 }
 0x1ee   : > { %v2462_v59 = vrot.slane %v2461_v12, 2  ;;  %v2518_v23 = vrot.slane %v2517_v7, 2  ;;  %v2574_v10 = vrot.slane %v2573_v27, 2  ;;  %v2630_v28 = vrot.slane %v2629_v1, 2 }
 0x1ef   : > { %v2239_v17 = vadd.f32 %v2238_v16, %v2237_v55  ;;  %v2295_v30 = vadd.f32 %v2294_v21, %v2293_v40  ;;  %v2351_v25 = vadd.f32 %v2350_v29, %v2349_v61  ;;  %v2407_v49 = vadd.f32 %v2406_v22, %v2405_v62 }
 0x1f0   : > { %v2463_v41 = vadd.f32 %v2462_v59, %v2461_v12  ;;  %v2519_v39 = vadd.f32 %v2518_v23, %v2517_v7  ;;  %v2575_v18 = vadd.f32 %v2574_v10, %v2573_v27  ;;  %v2631_v24 = vadd.f32 %v2630_v28, %v2629_v1 }
 0x1f1   : > { %v2240_v44 = vrot.slane %v2239_v17, 1  ;;  %v2296_v5 = vrot.slane %v2295_v30, 1  ;;  %v2352_v53 = vrot.slane %v2351_v25, 1  ;;  %v2408_v3 = vrot.slane %v2407_v49, 1 }
 0x1f2   : > { %v2464_v32 = vrot.slane %v2463_v41, 1  ;;  %v2520_v37 = vrot.slane %v2519_v39, 1  ;;  %v2576_v33 = vrot.slane %v2575_v18, 1  ;;  %v2632_v0 = vrot.slane %v2631_v24, 1 }
 0x1f3   : > { %v2241_v31 = vadd.f32 %v2240_v44, %v2239_v17  ;;  %v2297_v38 = vadd.f32 %v2296_v5, %v2295_v30  ;;  %v2353_v8 = vadd.f32 %v2352_v53, %v2351_v25  ;;  %v2409_v35 = vadd.f32 %v2408_v3, %v2407_v49 }
 0x1f4   : > { %v2465_v55 = vadd.f32 %v2464_v32, %v2463_v41  ;;  %v2521_v40 = vadd.f32 %v2520_v37, %v2519_v39  ;;  %v4470_v46 = vsel %vm2733_vm0, %v4423_v4, %v4416_v48  ;;  %v4475_v61 = vsel %vm2733_vm0, %v4425_v42, %v4421_v26  ;;  %v2046_v4 = vpop.permute.xlu0 %2045 }
 0x1f5   : > { %v4477_v62 = vadd.f32 %v2576_v33, %v2575_v18  ;;  %v4479_v12 = vadd.f32 %v2632_v0, %v2631_v24  ;;  %v4483_v7 = vsel %vm2735_vm1, %v2353_v8, %v4429_v11  ;;  %v4487_v16 = vsel %vm2735_vm1, %v2409_v35, %v4433_v63 }
 0x1f6   : > { %v4491_v48 = vsel %vm2735_vm1, %v2465_v55, %v4437_v15  ;;  %v4495_v26 = vsel %vm2735_vm1, %v2521_v40, %v4441_v45  ;;  %v4499_v42 = vsel %vm2735_vm1, %v2241_v31, %v4445_v14  ;;  %v4503_v11 = vsel %vm2735_vm1, %v2297_v38, %v4449_v58 }
 0x1f7   : > { %v2100_v63 = vmul.f32 %v2051_v9, %v4341_v6  ;;  %v2116_v21 = vmul.f32 %v2051_v9, %v4353_v47  ;;  %v2132_v15 = vmul.f32 %v2051_v9, %v4909_v43  ;;  %v2148_v27 = vmul.f32 %v2051_v9, %v4910_v36 }
 0x1f8   : > { %v2164_v45 = vmul.f32 %v2051_v9, %v4911_v54  ;;  %v2180_v1 = vmul.f32 %v2051_v9, %v4129_v51  ;;  %v2196_v29 = vmul.f32 %v2051_v9, %v4357_v56  ;;  %v2212_v14 = vmul.f32 %v2051_v9, %v4365_v20 }
 0x1f9   : > { %v2099_v22 = vmul.f32 %v2046_v4, %v4337_v13  ;;  %v2115_v58 = vmul.f32 %v2046_v4, %v4351_v52  ;;  %v2131_v59 = vmul.f32 %v2046_v4, %v4912_v2  ;;  %v2147_v23 = vmul.f32 %v2046_v4, %v4913_v60 }
 0x1fa   : > { %v2163_v17 = vmul.f32 %v2046_v4, %v4914_v57  ;;  %v2179_v30 = vmul.f32 %v2046_v4, %v4127_v50  ;;  %v2195_v10 = vmul.f32 %v2046_v4, %v4355_v19  ;;  %v2211_v28 = vmul.f32 %v2046_v4, %v4363_v34 }
 0x1fb   : > { %v2242_v25 = vadd.f32 %v2100_v63, %v2099_v22  ;;  %v2298_v49 = vadd.f32 %v2116_v21, %v2115_v58  ;;  %v2354_v41 = vadd.f32 %v2132_v15, %v2131_v59  ;;  %v2410_v39 = vadd.f32 %v2148_v27, %v2147_v23 }
 0x1fc   : > { %v2466_v44 = vadd.f32 %v2164_v45, %v2163_v17  ;;  %v2522_v5 = vadd.f32 %v2180_v1, %v2179_v30  ;;  %v2578_v53 = vadd.f32 %v2196_v29, %v2195_v10  ;;  %v2634_v3 = vadd.f32 %v2212_v14, %v2211_v28 }
 0x1fd   : > { %v2243_v18 = vrot.slane %v2242_v25, 4  ;;  %v2299_v24 = vrot.slane %v2298_v49, 4  ;;  %v2355_v32 = vrot.slane %v2354_v41, 4  ;;  %v2411_v37 = vrot.slane %v2410_v39, 4 }
 0x1fe   : > { %v2467_v31 = vrot.slane %v2466_v44, 4  ;;  %v2523_v38 = vrot.slane %v2522_v5, 4  ;;  %v2579_v8 = vrot.slane %v2578_v53, 4  ;;  %v2635_v35 = vrot.slane %v2634_v3, 4 }
 0x1ff   : > { %v2244_v33 = vadd.f32 %v2243_v18, %v2242_v25  ;;  %v2300_v0 = vadd.f32 %v2299_v24, %v2298_v49  ;;  %v2356_v55 = vadd.f32 %v2355_v32, %v2354_v41  ;;  %v2412_v40 = vadd.f32 %v2411_v37, %v2410_v39 }
 0x200   : > { %v2468_v9 = vadd.f32 %v2467_v31, %v2466_v44  ;;  %v2524_v4 = vadd.f32 %v2523_v38, %v2522_v5  ;;  %v2580_v15 = vadd.f32 %v2579_v8, %v2578_v53  ;;  %v2636_v27 = vadd.f32 %v2635_v35, %v2634_v3  ;;  %v2061_v8 = vpop.permute.xlu1 %2060 }
 0x201   : > { %v2245_v63 = vrot.slane %v2244_v33, 2  ;;  %v2301_v21 = vrot.slane %v2300_v0, 2  ;;  %v2357_v45 = vrot.slane %v2356_v55, 2  ;;  %v2413_v1 = vrot.slane %v2412_v40, 2 }
 0x202   : > { %v2469_v29 = vrot.slane %v2468_v9, 2  ;;  %v2525_v14 = vrot.slane %v2524_v4, 2  ;;  %v2581_v59 = vrot.slane %v2580_v15, 2  ;;  %v2637_v23 = vrot.slane %v2636_v27, 2 }
 0x203   : > { %v2246_v22 = vadd.f32 %v2245_v63, %v2244_v33  ;;  %v2302_v58 = vadd.f32 %v2301_v21, %v2300_v0  ;;  %v2358_v17 = vadd.f32 %v2357_v45, %v2356_v55  ;;  %v2414_v30 = vadd.f32 %v2413_v1, %v2412_v40 }
 0x204   : > { %v2470_v10 = vadd.f32 %v2469_v29, %v2468_v9  ;;  %v2526_v28 = vadd.f32 %v2525_v14, %v2524_v4  ;;  %v2582_v41 = vadd.f32 %v2581_v59, %v2580_v15  ;;  %v2638_v39 = vadd.f32 %v2637_v23, %v2636_v27 }
 0x205   : > { %v2247_v25 = vrot.slane %v2246_v22, 1  ;;  %v2303_v49 = vrot.slane %v2302_v58, 1  ;;  %v2359_v44 = vrot.slane %v2358_v17, 1  ;;  %v2415_v5 = vrot.slane %v2414_v30, 1 }
 0x206   : > { %v2471_v18 = vrot.slane %v2470_v10, 1  ;;  %v2527_v24 = vrot.slane %v2526_v28, 1  ;;  %v2583_v32 = vrot.slane %v2582_v41, 1  ;;  %v2639_v37 = vrot.slane %v2638_v39, 1 }
 0x207   : > { %v2248_v53 = vadd.f32 %v2247_v25, %v2246_v22  ;;  %v2304_v3 = vadd.f32 %v2303_v49, %v2302_v58  ;;  %v2360_v31 = vadd.f32 %v2359_v44, %v2358_v17  ;;  %v2416_v38 = vadd.f32 %v2415_v5, %v2414_v30 }
 0x208   : > { %v2472_v33 = vadd.f32 %v2471_v18, %v2470_v10  ;;  %v2528_v0 = vadd.f32 %v2527_v24, %v2526_v28  ;;  %v4524_v35 = vsel %vm2735_vm1, %v4477_v62, %v4470_v46  ;;  %v4529_v55 = vsel %vm2735_vm1, %v4479_v12, %v4475_v61  ;;  %v2056_v62 = vpop.permute.xlu0 %2055 }
 0x209   : > { %v4531_v40 = vadd.f32 %v2583_v32, %v2582_v41  ;;  %v4533_v9 = vadd.f32 %v2639_v37, %v2638_v39  ;;  %v4537_v4 = vsel %vm2737_vm2, %v2360_v31, %v4483_v7  ;;  %v4541_v63 = vsel %vm2737_vm2, %v2416_v38, %v4487_v16 }
 0x20a   : > { %v4545_v46 = vsel %vm2737_vm2, %v2472_v33, %v4491_v48  ;;  %v4549_v61 = vsel %vm2737_vm2, %v2528_v0, %v4495_v26  ;;  %v4553_v12 = vsel %vm2737_vm2, %v2248_v53, %v4499_v42  ;;  %v4557_v7 = vsel %vm2737_vm2, %v2304_v3, %v4503_v11 }
 0x20b   : > { %v2102_v16 = vmul.f32 %v2061_v8, %v4341_v6  ;;  %v2118_v21 = vmul.f32 %v2061_v8, %v4353_v47  ;;  %v2134_v48 = vmul.f32 %v2061_v8, %v4909_v43  ;;  %v2150_v15 = vmul.f32 %v2061_v8, %v4910_v36 }
 0x20c   : > { %v2166_v26 = vmul.f32 %v2061_v8, %v4911_v54  ;;  %v2182_v27 = vmul.f32 %v2061_v8, %v4129_v51  ;;  %v2198_v45 = vmul.f32 %v2061_v8, %v4357_v56  ;;  %v2214_v42 = vmul.f32 %v2061_v8, %v4365_v20 }
 0x20d   : > { %v2101_v1 = vmul.f32 %v2056_v62, %v4337_v13  ;;  %v2117_v11 = vmul.f32 %v2056_v62, %v4351_v52  ;;  %v2133_v29 = vmul.f32 %v2056_v62, %v4912_v2  ;;  %v2149_v14 = vmul.f32 %v2056_v62, %v4913_v60 }
 0x20e   : > { %v2165_v22 = vmul.f32 %v2056_v62, %v4914_v57  ;;  %v2181_v58 = vmul.f32 %v2056_v62, %v4127_v50  ;;  %v2197_v59 = vmul.f32 %v2056_v62, %v4355_v19  ;;  %v2213_v23 = vmul.f32 %v2056_v62, %v4363_v34 }
 0x20f   : > { %v2249_v17 = vadd.f32 %v2102_v16, %v2101_v1  ;;  %v2305_v30 = vadd.f32 %v2118_v21, %v2117_v11  ;;  %v2361_v10 = vadd.f32 %v2134_v48, %v2133_v29  ;;  %v2417_v28 = vadd.f32 %v2150_v15, %v2149_v14 }
 0x210   : > { %v2473_v25 = vadd.f32 %v2166_v26, %v2165_v22  ;;  %v2529_v49 = vadd.f32 %v2182_v27, %v2181_v58  ;;  %v2585_v44 = vadd.f32 %v2198_v45, %v2197_v59  ;;  %v2641_v5 = vadd.f32 %v2214_v42, %v2213_v23 }
 0x211   : > { %v2250_v41 = vrot.slane %v2249_v17, 4  ;;  %v2306_v39 = vrot.slane %v2305_v30, 4  ;;  %v2362_v18 = vrot.slane %v2361_v10, 4  ;;  %v2418_v24 = vrot.slane %v2417_v28, 4 }
 0x212   : > { %v2474_v53 = vrot.slane %v2473_v25, 4  ;;  %v2530_v3 = vrot.slane %v2529_v49, 4  ;;  %v2586_v31 = vrot.slane %v2585_v44, 4  ;;  %v2642_v38 = vrot.slane %v2641_v5, 4 }
 0x213   : > { %v2251_v32 = vadd.f32 %v2250_v41, %v2249_v17  ;;  %v2307_v37 = vadd.f32 %v2306_v39, %v2305_v30  ;;  %v2363_v33 = vadd.f32 %v2362_v18, %v2361_v10  ;;  %v2419_v0 = vadd.f32 %v2418_v24, %v2417_v28 }
 0x214   : > { %v2475_v8 = vadd.f32 %v2474_v53, %v2473_v25  ;;  %v2531_v62 = vadd.f32 %v2530_v3, %v2529_v49  ;;  %v2587_v48 = vadd.f32 %v2586_v31, %v2585_v44  ;;  %v2643_v15 = vadd.f32 %v2642_v38, %v2641_v5  ;;  %v2071_v31 = vpop.permute.xlu1 %2070 }
 0x215   : > { %v2252_v16 = vrot.slane %v2251_v32, 2  ;;  %v2308_v21 = vrot.slane %v2307_v37, 2  ;;  %v2364_v26 = vrot.slane %v2363_v33, 2  ;;  %v2420_v27 = vrot.slane %v2419_v0, 2 }
 0x216   : > { %v2476_v45 = vrot.slane %v2475_v8, 2  ;;  %v2532_v42 = vrot.slane %v2531_v62, 2  ;;  %v2588_v29 = vrot.slane %v2587_v48, 2  ;;  %v2644_v14 = vrot.slane %v2643_v15, 2 }
 0x217   : > { %v2253_v1 = vadd.f32 %v2252_v16, %v2251_v32  ;;  %v2309_v11 = vadd.f32 %v2308_v21, %v2307_v37  ;;  %v2365_v22 = vadd.f32 %v2364_v26, %v2363_v33  ;;  %v2421_v58 = vadd.f32 %v2420_v27, %v2419_v0 }
 0x218   : > { %v2477_v59 = vadd.f32 %v2476_v45, %v2475_v8  ;;  %v2533_v23 = vadd.f32 %v2532_v42, %v2531_v62  ;;  %v2589_v10 = vadd.f32 %v2588_v29, %v2587_v48  ;;  %v2645_v28 = vadd.f32 %v2644_v14, %v2643_v15 }
 0x219   : > { %v2254_v17 = vrot.slane %v2253_v1, 1  ;;  %v2310_v30 = vrot.slane %v2309_v11, 1  ;;  %v2366_v25 = vrot.slane %v2365_v22, 1  ;;  %v2422_v49 = vrot.slane %v2421_v58, 1 }
 0x21a   : > { %v2478_v41 = vrot.slane %v2477_v59, 1  ;;  %v2534_v39 = vrot.slane %v2533_v23, 1  ;;  %v2590_v18 = vrot.slane %v2589_v10, 1  ;;  %v2646_v24 = vrot.slane %v2645_v28, 1 }
 0x21b   : > { %v2255_v44 = vadd.f32 %v2254_v17, %v2253_v1  ;;  %v2311_v5 = vadd.f32 %v2310_v30, %v2309_v11  ;;  %v2367_v53 = vadd.f32 %v2366_v25, %v2365_v22  ;;  %v2423_v3 = vadd.f32 %v2422_v49, %v2421_v58 }
 0x21c   : > { %v2479_v32 = vadd.f32 %v2478_v41, %v2477_v59  ;;  %v2535_v37 = vadd.f32 %v2534_v39, %v2533_v23  ;;  %v4578_v38 = vsel %vm2737_vm2, %v4531_v40, %v4524_v35  ;;  %v4583_v33 = vsel %vm2737_vm2, %v4533_v9, %v4529_v55  ;;  %v2066_v40 = vpop.permute.xlu0 %2065 }
 0x21d   : > { %v4585_v0 = vadd.f32 %v2590_v18, %v2589_v10  ;;  %v4587_v8 = vadd.f32 %v2646_v24, %v2645_v28  ;;  %v4591_v62 = vsel %vm2739_vm3, %v2367_v53, %v4537_v4  ;;  %v4595_v16 = vsel %vm2739_vm3, %v2423_v3, %v4541_v63 }
 0x21e   : > { %v4599_v35 = vsel %vm2739_vm3, %v2479_v32, %v4545_v46  ;;  %v4603_v55 = vsel %vm2739_vm3, %v2535_v37, %v4549_v61  ;;  %v4607_v9 = vsel %vm2739_vm3, %v2255_v44, %v4553_v12  ;;  %v4611_v4 = vsel %vm2739_vm3, %v2311_v5, %v4557_v7 }
 0x21f   : > { %v2104_v63 = vmul.f32 %v2071_v31, %v4341_v6  ;;  %v2120_v21 = vmul.f32 %v2071_v31, %v4353_v47  ;;  %v2136_v46 = vmul.f32 %v2071_v31, %v4909_v43  ;;  %v2152_v48 = vmul.f32 %v2071_v31, %v4910_v36 }
 0x220   : > { %v2168_v61 = vmul.f32 %v2071_v31, %v4911_v54  ;;  %v2184_v15 = vmul.f32 %v2071_v31, %v4129_v51  ;;  %v2200_v26 = vmul.f32 %v2071_v31, %v4357_v56  ;;  %v2216_v12 = vmul.f32 %v2071_v31, %v4365_v20 }
 0x221   : > { %v2103_v27 = vmul.f32 %v2066_v40, %v4337_v13  ;;  %v2119_v7 = vmul.f32 %v2066_v40, %v4351_v52  ;;  %v2135_v45 = vmul.f32 %v2066_v40, %v4912_v2  ;;  %v2151_v42 = vmul.f32 %v2066_v40, %v4913_v60 }
 0x222   : > { %v2167_v1 = vmul.f32 %v2066_v40, %v4914_v57  ;;  %v2183_v11 = vmul.f32 %v2066_v40, %v4127_v50  ;;  %v2199_v29 = vmul.f32 %v2066_v40, %v4355_v19  ;;  %v2215_v14 = vmul.f32 %v2066_v40, %v4363_v34 }
 0x223   : > { %v2256_v22 = vadd.f32 %v2104_v63, %v2103_v27  ;;  %v2312_v58 = vadd.f32 %v2120_v21, %v2119_v7  ;;  %v2368_v59 = vadd.f32 %v2136_v46, %v2135_v45  ;;  %v2424_v23 = vadd.f32 %v2152_v48, %v2151_v42 }
 0x224   : > { %v2480_v17 = vadd.f32 %v2168_v61, %v2167_v1  ;;  %v2536_v30 = vadd.f32 %v2184_v15, %v2183_v11  ;;  %v2592_v25 = vadd.f32 %v2200_v26, %v2199_v29  ;;  %v2648_v49 = vadd.f32 %v2216_v12, %v2215_v14 }
 0x225   : > { %v2257_v10 = vrot.slane %v2256_v22, 4  ;;  %v2313_v28 = vrot.slane %v2312_v58, 4  ;;  %v2369_v41 = vrot.slane %v2368_v59, 4  ;;  %v2425_v39 = vrot.slane %v2424_v23, 4 }
 0x226   : > { %v2481_v44 = vrot.slane %v2480_v17, 4  ;;  %v2537_v5 = vrot.slane %v2536_v30, 4  ;;  %v2593_v53 = vrot.slane %v2592_v25, 4  ;;  %v2649_v3 = vrot.slane %v2648_v49, 4 }
 0x227   : > { %v2258_v18 = vadd.f32 %v2257_v10, %v2256_v22  ;;  %v2314_v24 = vadd.f32 %v2313_v28, %v2312_v58  ;;  %v2370_v32 = vadd.f32 %v2369_v41, %v2368_v59  ;;  %v2426_v37 = vadd.f32 %v2425_v39, %v2424_v23 }
 0x228   : > { %v2482_v31 = vadd.f32 %v2481_v44, %v2480_v17  ;;  %v2538_v40 = vadd.f32 %v2537_v5, %v2536_v30  ;;  %v2594_v46 = vadd.f32 %v2593_v53, %v2592_v25  ;;  %v2650_v48 = vadd.f32 %v2649_v3, %v2648_v49  ;;  %v2081_v53 = vpop.permute.xlu1 %2080 }
 0x229   : > { %v2259_v63 = vrot.slane %v2258_v18, 2  ;;  %v2315_v21 = vrot.slane %v2314_v24, 2  ;;  %v2371_v61 = vrot.slane %v2370_v32, 2  ;;  %v2427_v15 = vrot.slane %v2426_v37, 2 }
 0x22a   : > { %v2483_v26 = vrot.slane %v2482_v31, 2  ;;  %v2539_v12 = vrot.slane %v2538_v40, 2  ;;  %v2595_v45 = vrot.slane %v2594_v46, 2  ;;  %v2651_v42 = vrot.slane %v2650_v48, 2 }
 0x22b   : > { %v2260_v27 = vadd.f32 %v2259_v63, %v2258_v18  ;;  %v2316_v7 = vadd.f32 %v2315_v21, %v2314_v24  ;;  %v2372_v1 = vadd.f32 %v2371_v61, %v2370_v32  ;;  %v2428_v11 = vadd.f32 %v2427_v15, %v2426_v37 }
 0x22c   : > { %v2484_v29 = vadd.f32 %v2483_v26, %v2482_v31  ;;  %v2540_v14 = vadd.f32 %v2539_v12, %v2538_v40  ;;  %v2596_v59 = vadd.f32 %v2595_v45, %v2594_v46  ;;  %v2652_v23 = vadd.f32 %v2651_v42, %v2650_v48 }
 0x22d   : > { %v2261_v22 = vrot.slane %v2260_v27, 1  ;;  %v2317_v58 = vrot.slane %v2316_v7, 1  ;;  %v2373_v17 = vrot.slane %v2372_v1, 1  ;;  %v2429_v30 = vrot.slane %v2428_v11, 1 }
 0x22e   : > { %v2485_v10 = vrot.slane %v2484_v29, 1  ;;  %v2541_v28 = vrot.slane %v2540_v14, 1  ;;  %v2597_v41 = vrot.slane %v2596_v59, 1  ;;  %v2653_v39 = vrot.slane %v2652_v23, 1 }
 0x22f   : > { %v2262_v25 = vadd.f32 %v2261_v22, %v2260_v27  ;;  %v2318_v49 = vadd.f32 %v2317_v58, %v2316_v7  ;;  %v2374_v44 = vadd.f32 %v2373_v17, %v2372_v1  ;;  %v2430_v5 = vadd.f32 %v2429_v30, %v2428_v11 }
 0x230   : > { %v2486_v18 = vadd.f32 %v2485_v10, %v2484_v29  ;;  %v2542_v24 = vadd.f32 %v2541_v28, %v2540_v14  ;;  %v4632_v3 = vsel %vm2739_vm3, %v4585_v0, %v4578_v38  ;;  %v4637_v32 = vsel %vm2739_vm3, %v4587_v8, %v4583_v33  ;;  %v2076_v0 = vpop.permute.xlu0 %2075 }
 0x231   : > { %v4639_v37 = vadd.f32 %v2597_v41, %v2596_v59  ;;  %v4641_v31 = vadd.f32 %v2653_v39, %v2652_v23  ;;  %v4645_v40 = vsel %vm2741_vm4, %v2374_v44, %v4591_v62  ;;  %v4649_v63 = vsel %vm2741_vm4, %v2430_v5, %v4595_v16 }
 0x232   : > { %v4653_v38 = vsel %vm2741_vm4, %v2486_v18, %v4599_v35  ;;  %v4657_v33 = vsel %vm2741_vm4, %v2542_v24, %v4603_v55  ;;  %v4661_v8 = vsel %vm2741_vm4, %v2262_v25, %v4607_v9  ;;  %v4665_v62 = vsel %vm2741_vm4, %v2318_v49, %v4611_v4 }
 0x233   : > { %v2106_v16 = vmul.f32 %v2081_v53, %v4341_v6  ;;  %v2122_v21 = vmul.f32 %v2081_v53, %v4353_v47  ;;  %v2138_v35 = vmul.f32 %v2081_v53, %v4909_v43  ;;  %v2154_v46 = vmul.f32 %v2081_v53, %v4910_v36 }
 0x234   : > { %v2170_v55 = vmul.f32 %v2081_v53, %v4911_v54  ;;  %v2186_v48 = vmul.f32 %v2081_v53, %v4129_v51  ;;  %v2202_v61 = vmul.f32 %v2081_v53, %v4357_v56  ;;  %v2218_v9 = vmul.f32 %v2081_v53, %v4365_v20 }
 0x235   : > { %v2105_v15 = vmul.f32 %v2076_v0, %v4337_v13  ;;  %v2121_v4 = vmul.f32 %v2076_v0, %v4351_v52  ;;  %v2137_v26 = vmul.f32 %v2076_v0, %v4912_v2  ;;  %v2153_v12 = vmul.f32 %v2076_v0, %v4913_v60 }
 0x236   : > { %v2169_v27 = vmul.f32 %v2076_v0, %v4914_v57  ;;  %v2185_v7 = vmul.f32 %v2076_v0, %v4127_v50  ;;  %v2201_v45 = vmul.f32 %v2076_v0, %v4355_v19  ;;  %v2217_v42 = vmul.f32 %v2076_v0, %v4363_v34 }
 0x237   : > { %v2263_v1 = vadd.f32 %v2106_v16, %v2105_v15  ;;  %v2319_v11 = vadd.f32 %v2122_v21, %v2121_v4  ;;  %v2375_v29 = vadd.f32 %v2138_v35, %v2137_v26  ;;  %v2431_v14 = vadd.f32 %v2154_v46, %v2153_v12 }
 0x238   : > { %v2487_v22 = vadd.f32 %v2170_v55, %v2169_v27  ;;  %v2543_v58 = vadd.f32 %v2186_v48, %v2185_v7  ;;  %v2599_v17 = vadd.f32 %v2202_v61, %v2201_v45  ;;  %v2655_v30 = vadd.f32 %v2218_v9, %v2217_v42 }
 0x239   : > { %v2264_v59 = vrot.slane %v2263_v1, 4  ;;  %v2320_v23 = vrot.slane %v2319_v11, 4  ;;  %v2376_v10 = vrot.slane %v2375_v29, 4  ;;  %v2432_v28 = vrot.slane %v2431_v14, 4 }
 0x23a   : > { %v2488_v25 = vrot.slane %v2487_v22, 4  ;;  %v2544_v49 = vrot.slane %v2543_v58, 4  ;;  %v2600_v44 = vrot.slane %v2599_v17, 4  ;;  %v2656_v5 = vrot.slane %v2655_v30, 4 }
 0x23b   : > { %v2265_v41 = vadd.f32 %v2264_v59, %v2263_v1  ;;  %v2321_v39 = vadd.f32 %v2320_v23, %v2319_v11  ;;  %v2377_v18 = vadd.f32 %v2376_v10, %v2375_v29  ;;  %v2433_v24 = vadd.f32 %v2432_v28, %v2431_v14 }
 0x23c   : > { %v2489_v53 = vadd.f32 %v2488_v25, %v2487_v22  ;;  %v2545_v0 = vadd.f32 %v2544_v49, %v2543_v58  ;;  %v2601_v35 = vadd.f32 %v2600_v44, %v2599_v17  ;;  %v2657_v46 = vadd.f32 %v2656_v5, %v2655_v30  ;;  %v2091_v25 = vpop.permute.xlu1 %2090 }
 0x23d   : > { %v2266_v16 = vrot.slane %v2265_v41, 2  ;;  %v2322_v21 = vrot.slane %v2321_v39, 2  ;;  %v2378_v55 = vrot.slane %v2377_v18, 2  ;;  %v2434_v48 = vrot.slane %v2433_v24, 2 }
 0x23e   : > { %v2490_v61 = vrot.slane %v2489_v53, 2  ;;  %v2546_v9 = vrot.slane %v2545_v0, 2  ;;  %v2602_v26 = vrot.slane %v2601_v35, 2  ;;  %v2658_v12 = vrot.slane %v2657_v46, 2 }
 0x23f   : > { %v2267_v15 = vadd.f32 %v2266_v16, %v2265_v41  ;;  %v2323_v4 = vadd.f32 %v2322_v21, %v2321_v39  ;;  %v2379_v27 = vadd.f32 %v2378_v55, %v2377_v18  ;;  %v2435_v7 = vadd.f32 %v2434_v48, %v2433_v24 }
 0x240   : > { %v2491_v45 = vadd.f32 %v2490_v61, %v2489_v53  ;;  %v2547_v42 = vadd.f32 %v2546_v9, %v2545_v0  ;;  %v2603_v29 = vadd.f32 %v2602_v26, %v2601_v35  ;;  %v2659_v14 = vadd.f32 %v2658_v12, %v2657_v46 }
 0x241   : > { %v2268_v1 = vrot.slane %v2267_v15, 1  ;;  %v2324_v11 = vrot.slane %v2323_v4, 1  ;;  %v2380_v22 = vrot.slane %v2379_v27, 1  ;;  %v2436_v58 = vrot.slane %v2435_v7, 1 }
 0x242   : > { %v2492_v59 = vrot.slane %v2491_v45, 1  ;;  %v2548_v23 = vrot.slane %v2547_v42, 1  ;;  %v4686_v17 = vsel %vm2741_vm4, %v4639_v37, %v4632_v3  ;;  %v4691_v30 = vsel %vm2741_vm4, %v4641_v31, %v4637_v32  ;;  %v2086_v32 = vpop.permute.xlu0 %2085 }
 0x243   : > { %v2604_v10 = vrot.slane %v2603_v29, 1  ;;  %v2660_v28 = vrot.slane %v2659_v14, 1  ;;  %v4693_v49 = vadd.f32 %v2268_v1, %v2267_v15  ;;  %v4695_v41 = vadd.f32 %v2324_v11, %v2323_v4 }
 0x244   : > { %v4697_v39 = vadd.f32 %v2380_v22, %v2379_v27  ;;  %v4699_v44 = vadd.f32 %v2436_v58, %v2435_v7  ;;  %v4701_v5 = vadd.f32 %v2492_v59, %v2491_v45  ;;  %v4703_v3 = vadd.f32 %v2548_v23, %v2547_v42 }
 0x245   : > { %v4705_v37 = vadd.f32 %v2604_v10, %v2603_v29  ;;  %v4707_v18 = vadd.f32 %v2660_v28, %v2659_v14  ;;  %v2108_v31 = vmul.f32 %v2091_v25, %v4341_v6  ;;  %v2124_v24 = vmul.f32 %v2091_v25, %v4353_v47 }
 0x246   : > { %v2140_v53 = vmul.f32 %v2091_v25, %v4909_v43  ;;  %v2156_v0 = vmul.f32 %v2091_v25, %v4910_v36  ;;  %v2172_v16 = vmul.f32 %v2091_v25, %v4911_v54  ;;  %v2188_v21 = vmul.f32 %v2091_v25, %v4129_v51 }
 0x247   : > { %v2204_v35 = vmul.f32 %v2091_v25, %v4357_v56  ;;  %v2220_v46 = vmul.f32 %v2091_v25, %v4365_v20  ;;  %v2107_v55 = vmul.f32 %v2086_v32, %v4337_v13  ;;  %v2123_v48 = vmul.f32 %v2086_v32, %v4351_v52 }
 0x248   : > { %v2139_v6 = vmul.f32 %v2086_v32, %v4912_v2  ;;  %v2155_v47 = vmul.f32 %v2086_v32, %v4913_v60  ;;  %v2171_v43 = vmul.f32 %v2086_v32, %v4914_v57  ;;  %v2187_v36 = vmul.f32 %v2086_v32, %v4127_v50 }
 0x249   : > { %v2203_v54 = vmul.f32 %v2086_v32, %v4355_v19  ;;  %v2219_v51 = vmul.f32 %v2086_v32, %v4363_v34  ;;  %v2270_v61 = vadd.f32 %v2108_v31, %v2107_v55  ;;  %v2326_v56 = vadd.f32 %v2124_v24, %v2123_v48 }
 0x24a   : > { %v2382_v9 = vadd.f32 %v2140_v53, %v2139_v6  ;;  %v2438_v20 = vadd.f32 %v2156_v0, %v2155_v47  ;;  %v2494_v15 = vadd.f32 %v2172_v16, %v2171_v43  ;;  %v2550_v13 = vadd.f32 %v2188_v21, %v2187_v36 }
 0x24b   : > { %v2606_v4 = vadd.f32 %v2204_v35, %v2203_v54  ;;  %v2662_v52 = vadd.f32 %v2220_v46, %v2219_v51  ;;  %v2271_v26 = vrot.slane %v2270_v61, 4  ;;  %v2327_v2 = vrot.slane %v2326_v56, 4 }
 0x24c   : > { %v2383_v12 = vrot.slane %v2382_v9, 4  ;;  %v2439_v60 = vrot.slane %v2438_v20, 4  ;;  %v2495_v57 = vrot.slane %v2494_v15, 4  ;;  %v2551_v50 = vrot.slane %v2550_v13, 4 }
 0x24d   : > { %v2607_v27 = vrot.slane %v2606_v4, 4  ;;  %v2663_v19 = vrot.slane %v2662_v52, 4  ;;  %v2272_v34 = vadd.f32 %v2271_v26, %v2270_v61  ;;  %v2328_v7 = vadd.f32 %v2327_v2, %v2326_v56 }
 0x24e   : > { %v2384_v45 = vadd.f32 %v2383_v12, %v2382_v9  ;;  %v2440_v42 = vadd.f32 %v2439_v60, %v2438_v20  ;;  %v2496_v1 = vadd.f32 %v2495_v57, %v2494_v15  ;;  %v2552_v11 = vadd.f32 %v2551_v50, %v2550_v13 }
 0x24f   : > { %v2608_v29 = vadd.f32 %v2607_v27, %v2606_v4  ;;  %v2664_v14 = vadd.f32 %v2663_v19, %v2662_v52  ;;  %v2273_v22 = vrot.slane %v2272_v34, 2  ;;  %v2329_v58 = vrot.slane %v2328_v7, 2 }
 0x250   : > { %v2385_v59 = vrot.slane %v2384_v45, 2  ;;  %v2441_v23 = vrot.slane %v2440_v42, 2  ;;  %v2497_v10 = vrot.slane %v2496_v1, 2  ;;  %v2553_v28 = vrot.slane %v2552_v11, 2 }
 0x251   : > { %v2609_v25 = vrot.slane %v2608_v29, 2  ;;  %v2665_v32 = vrot.slane %v2664_v14, 2  ;;  %v2274_v31 = vadd.f32 %v2273_v22, %v2272_v34  ;;  %v2330_v24 = vadd.f32 %v2329_v58, %v2328_v7 }
 0x252   : > { %v2386_v53 = vadd.f32 %v2385_v59, %v2384_v45  ;;  %v2442_v0 = vadd.f32 %v2441_v23, %v2440_v42  ;;  %v2498_v16 = vadd.f32 %v2497_v10, %v2496_v1  ;;  %v2554_v21 = vadd.f32 %v2553_v28, %v2552_v11 }
 0x253   : > { %v2610_v35 = vadd.f32 %v2609_v25, %v2608_v29  ;;  %v2666_v46 = vadd.f32 %v2665_v32, %v2664_v14  ;;  %v2275_v55 = vrot.slane %v2274_v31, 1  ;;  %v2331_v48 = vrot.slane %v2330_v24, 1 }
 0x254   : > { %v2387_v6 = vrot.slane %v2386_v53, 1  ;;  %v2443_v47 = vrot.slane %v2442_v0, 1  ;;  %v2499_v43 = vrot.slane %v2498_v16, 1  ;;  %v2555_v36 = vrot.slane %v2554_v21, 1 }
 0x255   : > { %v2611_v54 = vrot.slane %v2610_v35, 1  ;;  %v2667_v51 = vrot.slane %v2666_v46, 1  ;;  %v2276_v61 = vadd.f32 %v2275_v55, %v2274_v31  ;;  %v2332_v56 = vadd.f32 %v2331_v48, %v2330_v24 }
 0x256   : > { %v2388_v9 = vadd.f32 %v2387_v6, %v2386_v53  ;;  %v2444_v20 = vadd.f32 %v2443_v47, %v2442_v0  ;;  %v2500_v15 = vadd.f32 %v2499_v43, %v2498_v16  ;;  %v2556_v13 = vadd.f32 %v2555_v36, %v2554_v21 }
 0x257   : > { %v2612_v4 = vadd.f32 %v2611_v54, %v2610_v35  ;;  %v2668_v52 = vadd.f32 %v2667_v51, %v2666_v46  ;;  %v2744_v26 = vsel %vm2743_vm5, %v4693_v49, %v4661_v8  ;;  %v2752_v2 = vsel %vm2743_vm5, %v4695_v41, %v4665_v62 }
 0x258   : > { %v2759_v12 = vsel %vm2743_vm5, %v4697_v39, %v4645_v40  ;;  %v2766_v60 = vsel %vm2743_vm5, %v4699_v44, %v4649_v63  ;;  %v2746_v57 = vsel %vm2745_vm6, %v2276_v61, %v2744_v26  ;;  %v2753_v50 = vsel %vm2745_vm6, %v2332_v56, %v2752_v2 }
 0x259   : > { %v2760_v8 = vsel %vm2745_vm6, %v2388_v9, %v2759_v12  ;;  %v2767_v49 = vsel %vm2745_vm6, %v2444_v20, %v2766_v60  ;;  %v2773_v40 = vsel %vm2743_vm5, %v4701_v5, %v4653_v38  ;;  %v2780_v63 = vsel %vm2743_vm5, %v4703_v3, %v4657_v33  ;;  %2804 = vst [vmem:[%s4729_s6] sm:$0xff] %v2746_v57 }
 0x25a   : > { %v2787_v62 = vsel %vm2743_vm5, %v4705_v37, %v4686_v17  ;;  %v2794_v41 = vsel %vm2743_vm5, %v4707_v18, %v4691_v30  ;;  %2805 = vst [vmem:[%s4729_s6 + $0x8] sm:$0xff] %v2753_v50  ;;  %2806 = vst [vmem:[%s4729_s6 + $0x10] sm:$0xff] %v2760_v8  ;;  %v2774_v38 = vsel %vm2745_vm6, %v2500_v15, %v2773_v40 }
 0x25b   : > { %2807 = vst [vmem:[%s4729_s6 + $0x18] sm:$0xff] %v2767_v49  ;;  %v2781_v39 = vsel %vm2745_vm6, %v2556_v13, %v2780_v63  ;;  %v2788_v33 = vsel %vm2745_vm6, %v2612_v4, %v2787_v62  ;;  %v2795_v44 = vsel %vm2745_vm6, %v2668_v52, %v2794_v41  ;;  %2808 = vst [vmem:[%s4729_s6 + $0x20] sm:$0xff] %v2774_v38 }
 0x25c   : > { %2809 = vst [vmem:[%s4729_s6 + $0x28] sm:$0xff] %v2781_v39  ;;  %2810 = vst [vmem:[%s4729_s6 + $0x30] sm:$0xff] %v2788_v33 }
 0x25d   : > { %2811 = vst [vmem:[%s4729_s6 + $0x38] sm:$0xff] %v2795_v44 }
 0x25e   : > { %3171 = shalt.err (!%p3168_p2)
}
 0x25f   : > { %s3172_s27 = scalar_lea.hbm %s4751_s17, 1024  ;;  %s3176_s30 = scalar_lea.hbm %s4824_s3, 2048 }
 0x260   : > { %p3173_p4 = scmp.ne.s32.totalorder %s4751_s17, %s3172_s27  ;;  %p3177_p9 = scmp.lt.u32.totalorder %s4751_s17, %s4824_s3 }
 0x261   : > { %p3178_p1 = scmp.lt.u32.totalorder %s3176_s30, %s3172_s27  ;;  %p3180_p6 = scmp.lt.u32.totalorder %s3172_s27, %s4751_s17 }
 0x262   : > { %p3174_p5 = pnand %p3173_p4, %p4915_p11 }
 0x263   : > { %p3179_p3 = por %p3178_p1, %p3177_p9 }
 0x264   : > { %p3175_p7 = pneg %p3174_p5 }
 0x265   : > { %p3181_p12 = por %p3180_p6, %p3179_p3 }
 0x267   : > { %p3182_p13 = pnand %p3181_p12, %p3175_p7 }
 0x269   : > { %3185 = shalt.err (!%p3182_p13)
}
 0x26a   : > { %s3231_s11 = smov 128   ;;  %s3232_s4 = smov 8  }
 0x26b   : > { %3045 = dma.vmem_to_hbm [thread:$0]  (%p4915_p11), %s4753_s7, 1024, %s4751_s17, %s2813_s19, %s3231_s11, %s3231_s11, %s3232_s4  }
 0x26c PF: > { %s2841_s6 = sand.u32 1, %s3212_s12   ;;  %p4916_p8 = scmp.ne.s32.totalorder %s4857_s25, 0 }
 0x26d   : > { %p4917_p10 = scmp.ge.s32.totalorder %s3224_s15, 2  ;;  %s2842_s16 = scalar_lea.sflag [#allocation4], %s2841_s6 }
 0x26f   : > { %p3052_p0 = pnand %p4917_p10, %p4916_p8 }
 0x271   : > { %3207 = dma.done.wait (!%p3052_p0), %s2842_s16, 1024  }
 0x272   : > { %3209 = vsyncadd (!%p3052_p0), %s2842_s16, 4294966272  ;;  %p16_p2 = scmp.ge.s32.totalorder %s3278_s18, 4   ;;  %s4918_s12 = smov %s3216_s13 }
 0x273   : > { %s4919_s13 = smov %s3220_s14  ;;  %s4920_s14 = smov %s3290_s21 }
 0x274   : > { %s4921_s15 = smov %s3278_s18  ;;  %18 = sbr.rel (!%p16_p2) target bundleno = 5 (0x5), region = 77 }
 0x27b   :  { %2847 = vsyncpa [#allocation3], 1 }
 0x27c   :  { %2849 = vsyncpa [#allocation3 + $0x1], 1 }
 0x27d   :  { %2850 = vsyncpa [#allocation4], 1 }
 0x27e   :  { %2852 = vsyncpa [#allocation4 + $0x1], 1 }

</bundles_post_ra>
